<compile_context>
chip_gen: v7x
topology: tpu7x:2x2x1
jax: 0.10.0
libtpu: 0.0.40
codegen_flags: <defaults>
</compile_context>

<pallas_src>
import jax
import jax.numpy as jnp
from jax.experimental import pallas as pl
from jax.experimental.pallas import tpu as pltpu


def skipgram_kernel(idx_ref, emb_hbm, w_ref, b_ref, out_ref,
                    emb_vmem, m_sc, l_sc, gather_sem):
    # idx_ref : [B_pad] int32 in SMEM (scalar prefetch)
    # emb_hbm : [V, E] embedding table, raw HBM ref
    # w_ref   : (E, TV) fc-weight tile (transposed layout), VMEM
    # b_ref   : (1, TV) bias tile, VMEM
    # out_ref : (B_tile, V_pad) resident output block (accumulator over vocab tiles)
    # emb_vmem: (B_tile, E) gathered embedding rows (persist across vocab tiles)
    # m_sc/l_sc: (B_tile, 1) running max / running sum-exp
    i = pl.program_id(0)            # batch tile ("parallel")
    v = pl.program_id(1)            # vocab tile ("arbitrary", innermost)
    nv = pl.num_programs(1)

    b_tile = emb_vmem.shape[0]
    tv = w_ref.shape[1]

    # ---- once per batch tile: gather embedding rows + reset softmax state ----
    @pl.when(v == 0)
    def _():
        base = i * b_tile
        # issue all row-gather DMAs first ...
        for r in range(b_tile):                       # small static unroll
            pltpu.make_async_copy(
                emb_hbm.at[idx_ref[base + r]], emb_vmem.at[r], gather_sem.at[r]
            ).start()
        # ... do the (cheap) state reset while the DMAs are in flight ...
        m_sc[...] = jnp.full_like(m_sc, -jnp.inf)
        l_sc[...] = jnp.zeros_like(l_sc)
        # ... then wait for the gathered rows.
        for r in range(b_tile):
            pltpu.make_async_copy(
                emb_hbm.at[idx_ref[base + r]], emb_vmem.at[r], gather_sem.at[r]
            ).wait()

    # ---- hot path: one batched (B_tile, E) x (E, TV) matmul on the MXU ----
    e = emb_vmem[...].astype(w_ref.dtype)
    logits = jnp.dot(e, w_ref[...], preferred_element_type=jnp.float32)
    logits = logits + b_ref[...].astype(jnp.float32)

    # stash raw logits into the resident output block (128-aligned lane slice)
    start = pl.multiple_of(v * tv, 128)
    out_ref[:, pl.ds(start, tv)] = logits.astype(out_ref.dtype)

    # ---- online log-sum-exp across vocab tiles (exp/log run on the EUP) ----
    tile_max = jnp.max(logits, axis=-1, keepdims=True)
    m_new = jnp.maximum(m_sc[...], tile_max)
    l_sc[...] = (jnp.exp(m_sc[...] - m_new) * l_sc[...]
                 + jnp.sum(jnp.exp(logits - m_new), axis=-1, keepdims=True))
    m_sc[...] = m_new

    # ---- last vocab tile: normalize the resident row block (VMEM-only) ----
    @pl.when(v == nv - 1)
    def _():
        lse = m_sc[...] + jnp.log(l_sc[...])          # (B_tile, 1)
        out_ref[...] = out_ref[...] - lse


def skipgram_forward(indices, emb_table, fc_weight, fc_bias, *,
                     b_tile=None, v_tile=256):
    """SkipGram forward.

    indices   : [B] int token ids
    emb_table : [V, E]  (nn.Embedding.weight)
    fc_weight : [V, E]  (nn.Linear.weight layout)
    fc_bias   : [V]     (nn.Linear.bias)
    returns   : [B, V] float32 log-probabilities
    """
    B = int(indices.shape[0])
    V, E = emb_table.shape
    assert fc_weight.shape == (V, E) and fc_bias.shape == (V,)

    # --- batch tiling: multiple of 8 sublanes, capped for VMEM / unroll size ---
    if b_tile is None:
        b_tile = min(64, max(8, ((B + 7) // 8) * 8))
    b_tile = max(8, (b_tile // 8) * 8)
    n_btiles = pl.cdiv(B, b_tile)
    b_pad = n_btiles * b_tile
    idx = jnp.zeros((b_pad,), jnp.int32).at[:B].set(indices.astype(jnp.int32))

    # --- vocab tiling: lane-multiple tiles; pad V up to a tile multiple ---
    v_tile = max(128, (min(v_tile, ((V + 127) // 128) * 128) // 128) * 128)
    n_vtiles = pl.cdiv(V, v_tile)
    v_pad = n_vtiles * v_tile

    w_t = jnp.transpose(fc_weight)                    # [E, V]
    bias = fc_bias
    if v_pad != V:
        # zero weights + very negative bias -> padded columns add exp(.) == 0
        w_t = jnp.pad(w_t, ((0, 0), (0, v_pad - V)))
        bias = jnp.pad(fc_bias, (0, v_pad - V), constant_values=-1e30)
    bias2d = bias.reshape(1, v_pad)

    grid_spec = pltpu.PrefetchScalarGridSpec(
        num_scalar_prefetch=1,
        grid=(n_btiles, n_vtiles),
        in_specs=[
            # embedding table stays in HBM; rows gathered manually in-kernel
            pl.BlockSpec(memory_space=pl.ANY),
            # fc weight (transposed) streamed over vocab tiles
            pl.BlockSpec((E, v_tile), lambda i, v, idx: (0, v)),
            # bias tile
            pl.BlockSpec((1, v_tile), lambda i, v, idx: (0, v)),
        ],
        # (B_tile, V_pad) block resident across the vocab axis (accumulator)
        out_specs=pl.BlockSpec((b_tile, v_pad), lambda i, v, idx: (i, 0)),
        scratch_shapes=[
            pltpu.VMEM((b_tile, E), emb_table.dtype),   # gathered embedding rows
            pltpu.VMEM((b_tile, 1), jnp.float32),       # running max
            pltpu.VMEM((b_tile, 1), jnp.float32),       # running sum-exp
            pltpu.SemaphoreType.DMA((b_tile,)),
        ],
    )

    out = pl.pallas_call(
        skipgram_kernel,
        out_shape=jax.ShapeDtypeStruct((b_pad, v_pad), jnp.float32),
        grid_spec=grid_spec,
        compiler_params=pltpu.CompilerParams(
            dimension_semantics=("parallel", "arbitrary"),
            vmem_limit_bytes=64 * 1024 * 1024,          # headroom for big vocab blocks
        ),
    )(idx, emb_table, w_t, bias2d)
    return out[:B, :V]


if __name__ == "__main__":
    # Small shapes; v_tile=256 with n_vocab=512 exercises the online log-softmax
    # across two vocab tiles.
    n_vocab, n_embed, batch = 512, 128, 8

    key = jax.random.PRNGKey(0)
    k_emb, k_w, k_b, k_idx = jax.random.split(key, 4)

    # Deterministic synthetic parameters (shapes match nn.Embedding / nn.Linear).
    emb_table = jax.random.normal(k_emb, (n_vocab, n_embed), dtype=jnp.float32)
    fc_weight = jax.random.uniform(
        k_w, (n_vocab, n_embed), minval=-0.1, maxval=0.1, dtype=jnp.float32
    )
    fc_bias = jax.random.uniform(
        k_b, (n_vocab,), minval=-0.1, maxval=0.1, dtype=jnp.float32
    )
    indices = jax.random.randint(k_idx, (batch,), 0, n_vocab, dtype=jnp.int32)

    out = skipgram_forward(indices, emb_table, fc_weight, fc_bias, v_tile=256)
    out = jax.block_until_ready(out)

    # Reference check in plain JAX.
    ref_logits = emb_table[indices] @ fc_weight.T + fc_bias
    ref = jax.nn.log_softmax(ref_logits, axis=1)
    assert out.shape == (batch, n_vocab)
    assert jnp.allclose(out, ref, atol=1e-3, rtol=1e-3)

    print("KERNEL_OK")
</pallas_src>

<mosaic_0001>
module attributes {stable_mosaic.version = 11 : i64} {
  func.func @skipgram_kernel(%arg0: i32, %arg1: i32, %arg2: memref<8xi32, #tpu.memory_space<smem>>, %arg3: memref<512x128xf32, #tpu.memory_space<any>>, %arg4: memref<128x256xf32, #tpu.memory_space<vmem>>, %arg5: memref<1x256xf32, #tpu.memory_space<vmem>>, %arg6: memref<8x512xf32, #tpu.memory_space<vmem>>, %arg7: memref<8x128xf32, #tpu.memory_space<vmem>>, %arg8: memref<8x1xf32, #tpu.memory_space<vmem>>, %arg9: memref<8x1xf32, #tpu.memory_space<vmem>>, %arg10: memref<8x!tpu.dma_semaphore, #tpu.memory_space<semaphore_mem>>) attributes {dimension_semantics = [#tpu.dimension_semantics<parallel>, #tpu.dimension_semantics<arbitrary>], iteration_bounds = array<i64: 1, 2>, scalar_prefetch = 1 : i64, scratch_operands = 4 : i64, tpu.core_type = #tpu.core_type<tc>, window_params = [{}, {transform_indices = @transform_1, window_bounds = array<i64: 128, 256>}, {transform_indices = @transform_2, window_bounds = array<i64: 1, 256>}, {transform_indices = @transform_3, window_bounds = array<i64: 8, 512>}]} {
    %c0_i32 = arith.constant 0 : i32
    %0 = arith.cmpi eq, %arg1, %c0_i32 : i32
    %1 = arith.extui %0 : i1 to i32
    %c0_i32_0 = arith.constant 0 : i32
    %2 = arith.cmpi ne, %1, %c0_i32_0 : i32
    scf.if %2 {
      %c8_i32 = arith.constant 8 : i32
      %33 = arith.muli %arg0, %c8_i32 : i32
      %c0_i32_20 = arith.constant 0 : i32
      %34 = arith.addi %33, %c0_i32_20 : i32
      %35 = arith.index_cast %34 : i32 to index
      %36 = memref.load %arg2[%35] : memref<8xi32, #tpu.memory_space<smem>>
      %c0_i32_21 = arith.constant 0 : i32
      %c0_i32_22 = arith.constant 0 : i32
      %c0_i32_23 = arith.constant 0 : i32
      %37 = tpu.memref_slice %arg3[%36, %c0_i32_23] : memref<512x128xf32, #tpu.memory_space<any>> -> memref<1x128xf32, #tpu.memory_space<any>>
      %38 = tpu.memref_squeeze %37 : memref<1x128xf32, #tpu.memory_space<any>> -> memref<128xf32, #tpu.memory_space<any>>
      %c0_i32_24 = arith.constant 0 : i32
      %39 = tpu.memref_slice %arg7[%c0_i32_21, %c0_i32_24] : memref<8x128xf32, #tpu.memory_space<vmem>> -> memref<1x128xf32, #tpu.memory_space<vmem>>
      %40 = tpu.memref_squeeze %39 : memref<1x128xf32, #tpu.memory_space<vmem>> -> memref<128xf32, #tpu.memory_space<vmem>>
      %41 = tpu.memref_slice %arg10[%c0_i32_22] : memref<8x!tpu.dma_semaphore, #tpu.memory_space<semaphore_mem>> -> memref<1x!tpu.dma_semaphore, #tpu.memory_space<semaphore_mem>>
      %42 = tpu.memref_squeeze %41 : memref<1x!tpu.dma_semaphore, #tpu.memory_space<semaphore_mem>> -> memref<!tpu.dma_semaphore, #tpu.memory_space<semaphore_mem>>
      tpu.enqueue_dma source(%38 : memref<128xf32, #tpu.memory_space<any>>) target(%40 : memref<128xf32, #tpu.memory_space<vmem>>) target_semaphore(%42 : memref<!tpu.dma_semaphore, #tpu.memory_space<semaphore_mem>>)
      %c1_i32_25 = arith.constant 1 : i32
      %43 = arith.addi %33, %c1_i32_25 : i32
      %44 = arith.index_cast %43 : i32 to index
      %45 = memref.load %arg2[%44] : memref<8xi32, #tpu.memory_space<smem>>
      %c1_i32_26 = arith.constant 1 : i32
      %c1_i32_27 = arith.constant 1 : i32
      %c0_i32_28 = arith.constant 0 : i32
      %46 = tpu.memref_slice %arg3[%45, %c0_i32_28] : memref<512x128xf32, #tpu.memory_space<any>> -> memref<1x128xf32, #tpu.memory_space<any>>
      %47 = tpu.memref_squeeze %46 : memref<1x128xf32, #tpu.memory_space<any>> -> memref<128xf32, #tpu.memory_space<any>>
      %c0_i32_29 = arith.constant 0 : i32
      %48 = tpu.memref_slice %arg7[%c1_i32_26, %c0_i32_29] : memref<8x128xf32, #tpu.memory_space<vmem>> -> memref<1x128xf32, #tpu.memory_space<vmem>>
      %49 = tpu.memref_squeeze %48 : memref<1x128xf32, #tpu.memory_space<vmem>> -> memref<128xf32, #tpu.memory_space<vmem>>
      %50 = tpu.memref_slice %arg10[%c1_i32_27] : memref<8x!tpu.dma_semaphore, #tpu.memory_space<semaphore_mem>> -> memref<1x!tpu.dma_semaphore, #tpu.memory_space<semaphore_mem>>
      %51 = tpu.memref_squeeze %50 : memref<1x!tpu.dma_semaphore, #tpu.memory_space<semaphore_mem>> -> memref<!tpu.dma_semaphore, #tpu.memory_space<semaphore_mem>>
      tpu.enqueue_dma source(%47 : memref<128xf32, #tpu.memory_space<any>>) target(%49 : memref<128xf32, #tpu.memory_space<vmem>>) target_semaphore(%51 : memref<!tpu.dma_semaphore, #tpu.memory_space<semaphore_mem>>)
      %c2_i32 = arith.constant 2 : i32
      %52 = arith.addi %33, %c2_i32 : i32
      %53 = arith.index_cast %52 : i32 to index
      %54 = memref.load %arg2[%53] : memref<8xi32, #tpu.memory_space<smem>>
      %c2_i32_30 = arith.constant 2 : i32
      %c2_i32_31 = arith.constant 2 : i32
      %c0_i32_32 = arith.constant 0 : i32
      %55 = tpu.memref_slice %arg3[%54, %c0_i32_32] : memref<512x128xf32, #tpu.memory_space<any>> -> memref<1x128xf32, #tpu.memory_space<any>>
      %56 = tpu.memref_squeeze %55 : memref<1x128xf32, #tpu.memory_space<any>> -> memref<128xf32, #tpu.memory_space<any>>
      %c0_i32_33 = arith.constant 0 : i32
      %57 = tpu.memref_slice %arg7[%c2_i32_30, %c0_i32_33] : memref<8x128xf32, #tpu.memory_space<vmem>> -> memref<1x128xf32, #tpu.memory_space<vmem>>
      %58 = tpu.memref_squeeze %57 : memref<1x128xf32, #tpu.memory_space<vmem>> -> memref<128xf32, #tpu.memory_space<vmem>>
      %59 = tpu.memref_slice %arg10[%c2_i32_31] : memref<8x!tpu.dma_semaphore, #tpu.memory_space<semaphore_mem>> -> memref<1x!tpu.dma_semaphore, #tpu.memory_space<semaphore_mem>>
      %60 = tpu.memref_squeeze %59 : memref<1x!tpu.dma_semaphore, #tpu.memory_space<semaphore_mem>> -> memref<!tpu.dma_semaphore, #tpu.memory_space<semaphore_mem>>
      tpu.enqueue_dma source(%56 : memref<128xf32, #tpu.memory_space<any>>) target(%58 : memref<128xf32, #tpu.memory_space<vmem>>) target_semaphore(%60 : memref<!tpu.dma_semaphore, #tpu.memory_space<semaphore_mem>>)
      %c3_i32 = arith.constant 3 : i32
      %61 = arith.addi %33, %c3_i32 : i32
      %62 = arith.index_cast %61 : i32 to index
      %63 = memref.load %arg2[%62] : memref<8xi32, #tpu.memory_space<smem>>
      %c3_i32_34 = arith.constant 3 : i32
      %c3_i32_35 = arith.constant 3 : i32
      %c0_i32_36 = arith.constant 0 : i32
      %64 = tpu.memref_slice %arg3[%63, %c0_i32_36] : memref<512x128xf32, #tpu.memory_space<any>> -> memref<1x128xf32, #tpu.memory_space<any>>
      %65 = tpu.memref_squeeze %64 : memref<1x128xf32, #tpu.memory_space<any>> -> memref<128xf32, #tpu.memory_space<any>>
      %c0_i32_37 = arith.constant 0 : i32
      %66 = tpu.memref_slice %arg7[%c3_i32_34, %c0_i32_37] : memref<8x128xf32, #tpu.memory_space<vmem>> -> memref<1x128xf32, #tpu.memory_space<vmem>>
      %67 = tpu.memref_squeeze %66 : memref<1x128xf32, #tpu.memory_space<vmem>> -> memref<128xf32, #tpu.memory_space<vmem>>
      %68 = tpu.memref_slice %arg10[%c3_i32_35] : memref<8x!tpu.dma_semaphore, #tpu.memory_space<semaphore_mem>> -> memref<1x!tpu.dma_semaphore, #tpu.memory_space<semaphore_mem>>
      %69 = tpu.memref_squeeze %68 : memref<1x!tpu.dma_semaphore, #tpu.memory_space<semaphore_mem>> -> memref<!tpu.dma_semaphore, #tpu.memory_space<semaphore_mem>>
      tpu.enqueue_dma source(%65 : memref<128xf32, #tpu.memory_space<any>>) target(%67 : memref<128xf32, #tpu.memory_space<vmem>>) target_semaphore(%69 : memref<!tpu.dma_semaphore, #tpu.memory_space<semaphore_mem>>)
      %c4_i32 = arith.constant 4 : i32
      %70 = arith.addi %33, %c4_i32 : i32
      %71 = arith.index_cast %70 : i32 to index
      %72 = memref.load %arg2[%71] : memref<8xi32, #tpu.memory_space<smem>>
      %c4_i32_38 = arith.constant 4 : i32
      %c4_i32_39 = arith.constant 4 : i32
      %c0_i32_40 = arith.constant 0 : i32
      %73 = tpu.memref_slice %arg3[%72, %c0_i32_40] : memref<512x128xf32, #tpu.memory_space<any>> -> memref<1x128xf32, #tpu.memory_space<any>>
      %74 = tpu.memref_squeeze %73 : memref<1x128xf32, #tpu.memory_space<any>> -> memref<128xf32, #tpu.memory_space<any>>
      %c0_i32_41 = arith.constant 0 : i32
      %75 = tpu.memref_slice %arg7[%c4_i32_38, %c0_i32_41] : memref<8x128xf32, #tpu.memory_space<vmem>> -> memref<1x128xf32, #tpu.memory_space<vmem>>
      %76 = tpu.memref_squeeze %75 : memref<1x128xf32, #tpu.memory_space<vmem>> -> memref<128xf32, #tpu.memory_space<vmem>>
      %77 = tpu.memref_slice %arg10[%c4_i32_39] : memref<8x!tpu.dma_semaphore, #tpu.memory_space<semaphore_mem>> -> memref<1x!tpu.dma_semaphore, #tpu.memory_space<semaphore_mem>>
      %78 = tpu.memref_squeeze %77 : memref<1x!tpu.dma_semaphore, #tpu.memory_space<semaphore_mem>> -> memref<!tpu.dma_semaphore, #tpu.memory_space<semaphore_mem>>
      tpu.enqueue_dma source(%74 : memref<128xf32, #tpu.memory_space<any>>) target(%76 : memref<128xf32, #tpu.memory_space<vmem>>) target_semaphore(%78 : memref<!tpu.dma_semaphore, #tpu.memory_space<semaphore_mem>>)
      %c5_i32 = arith.constant 5 : i32
      %79 = arith.addi %33, %c5_i32 : i32
      %80 = arith.index_cast %79 : i32 to index
      %81 = memref.load %arg2[%80] : memref<8xi32, #tpu.memory_space<smem>>
      %c5_i32_42 = arith.constant 5 : i32
      %c5_i32_43 = arith.constant 5 : i32
      %c0_i32_44 = arith.constant 0 : i32
      %82 = tpu.memref_slice %arg3[%81, %c0_i32_44] : memref<512x128xf32, #tpu.memory_space<any>> -> memref<1x128xf32, #tpu.memory_space<any>>
      %83 = tpu.memref_squeeze %82 : memref<1x128xf32, #tpu.memory_space<any>> -> memref<128xf32, #tpu.memory_space<any>>
      %c0_i32_45 = arith.constant 0 : i32
      %84 = tpu.memref_slice %arg7[%c5_i32_42, %c0_i32_45] : memref<8x128xf32, #tpu.memory_space<vmem>> -> memref<1x128xf32, #tpu.memory_space<vmem>>
      %85 = tpu.memref_squeeze %84 : memref<1x128xf32, #tpu.memory_space<vmem>> -> memref<128xf32, #tpu.memory_space<vmem>>
      %86 = tpu.memref_slice %arg10[%c5_i32_43] : memref<8x!tpu.dma_semaphore, #tpu.memory_space<semaphore_mem>> -> memref<1x!tpu.dma_semaphore, #tpu.memory_space<semaphore_mem>>
      %87 = tpu.memref_squeeze %86 : memref<1x!tpu.dma_semaphore, #tpu.memory_space<semaphore_mem>> -> memref<!tpu.dma_semaphore, #tpu.memory_space<semaphore_mem>>
      tpu.enqueue_dma source(%83 : memref<128xf32, #tpu.memory_space<any>>) target(%85 : memref<128xf32, #tpu.memory_space<vmem>>) target_semaphore(%87 : memref<!tpu.dma_semaphore, #tpu.memory_space<semaphore_mem>>)
      %c6_i32 = arith.constant 6 : i32
      %88 = arith.addi %33, %c6_i32 : i32
      %89 = arith.index_cast %88 : i32 to index
      %90 = memref.load %arg2[%89] : memref<8xi32, #tpu.memory_space<smem>>
      %c6_i32_46 = arith.constant 6 : i32
      %c6_i32_47 = arith.constant 6 : i32
      %c0_i32_48 = arith.constant 0 : i32
      %91 = tpu.memref_slice %arg3[%90, %c0_i32_48] : memref<512x128xf32, #tpu.memory_space<any>> -> memref<1x128xf32, #tpu.memory_space<any>>
      %92 = tpu.memref_squeeze %91 : memref<1x128xf32, #tpu.memory_space<any>> -> memref<128xf32, #tpu.memory_space<any>>
      %c0_i32_49 = arith.constant 0 : i32
      %93 = tpu.memref_slice %arg7[%c6_i32_46, %c0_i32_49] : memref<8x128xf32, #tpu.memory_space<vmem>> -> memref<1x128xf32, #tpu.memory_space<vmem>>
      %94 = tpu.memref_squeeze %93 : memref<1x128xf32, #tpu.memory_space<vmem>> -> memref<128xf32, #tpu.memory_space<vmem>>
      %95 = tpu.memref_slice %arg10[%c6_i32_47] : memref<8x!tpu.dma_semaphore, #tpu.memory_space<semaphore_mem>> -> memref<1x!tpu.dma_semaphore, #tpu.memory_space<semaphore_mem>>
      %96 = tpu.memref_squeeze %95 : memref<1x!tpu.dma_semaphore, #tpu.memory_space<semaphore_mem>> -> memref<!tpu.dma_semaphore, #tpu.memory_space<semaphore_mem>>
      tpu.enqueue_dma source(%92 : memref<128xf32, #tpu.memory_space<any>>) target(%94 : memref<128xf32, #tpu.memory_space<vmem>>) target_semaphore(%96 : memref<!tpu.dma_semaphore, #tpu.memory_space<semaphore_mem>>)
      %c7_i32 = arith.constant 7 : i32
      %97 = arith.addi %33, %c7_i32 : i32
      %98 = arith.index_cast %97 : i32 to index
      %99 = memref.load %arg2[%98] : memref<8xi32, #tpu.memory_space<smem>>
      %c7_i32_50 = arith.constant 7 : i32
      %c7_i32_51 = arith.constant 7 : i32
      %c0_i32_52 = arith.constant 0 : i32
      %100 = tpu.memref_slice %arg3[%99, %c0_i32_52] : memref<512x128xf32, #tpu.memory_space<any>> -> memref<1x128xf32, #tpu.memory_space<any>>
      %101 = tpu.memref_squeeze %100 : memref<1x128xf32, #tpu.memory_space<any>> -> memref<128xf32, #tpu.memory_space<any>>
      %c0_i32_53 = arith.constant 0 : i32
      %102 = tpu.memref_slice %arg7[%c7_i32_50, %c0_i32_53] : memref<8x128xf32, #tpu.memory_space<vmem>> -> memref<1x128xf32, #tpu.memory_space<vmem>>
      %103 = tpu.memref_squeeze %102 : memref<1x128xf32, #tpu.memory_space<vmem>> -> memref<128xf32, #tpu.memory_space<vmem>>
      %104 = tpu.memref_slice %arg10[%c7_i32_51] : memref<8x!tpu.dma_semaphore, #tpu.memory_space<semaphore_mem>> -> memref<1x!tpu.dma_semaphore, #tpu.memory_space<semaphore_mem>>
      %105 = tpu.memref_squeeze %104 : memref<1x!tpu.dma_semaphore, #tpu.memory_space<semaphore_mem>> -> memref<!tpu.dma_semaphore, #tpu.memory_space<semaphore_mem>>
      tpu.enqueue_dma source(%101 : memref<128xf32, #tpu.memory_space<any>>) target(%103 : memref<128xf32, #tpu.memory_space<vmem>>) target_semaphore(%105 : memref<!tpu.dma_semaphore, #tpu.memory_space<semaphore_mem>>)
      %cst_54 = arith.constant 0xFF800000 : f32
      %106 = vector.broadcast %cst_54 : f32 to vector<8x1xf32>
      %c0_55 = arith.constant 0 : index
      %c0_56 = arith.constant 0 : index
      %107 = vector.load %arg8[%c0_55, %c0_56] : memref<8x1xf32, #tpu.memory_space<vmem>>, vector<8x1xf32>
      tpu.vector_store %arg8[%c0_55, %c0_56], %106 {strides = array<i32>} : memref<8x1xf32, #tpu.memory_space<vmem>>, vector<8x1xf32>,
      %cst_57 = arith.constant 0.000000e+00 : f32
      %108 = vector.broadcast %cst_57 : f32 to vector<8x1xf32>
      %c0_58 = arith.constant 0 : index
      %c0_59 = arith.constant 0 : index
      %109 = vector.load %arg9[%c0_58, %c0_59] : memref<8x1xf32, #tpu.memory_space<vmem>>, vector<8x1xf32>
      tpu.vector_store %arg9[%c0_58, %c0_59], %108 {strides = array<i32>} : memref<8x1xf32, #tpu.memory_space<vmem>>, vector<8x1xf32>,
      %c0_i32_60 = arith.constant 0 : i32
      %110 = arith.addi %33, %c0_i32_60 : i32
      %111 = arith.index_cast %110 : i32 to index
      %112 = memref.load %arg2[%111] : memref<8xi32, #tpu.memory_space<smem>>
      %c0_i32_61 = arith.constant 0 : i32
      %c0_i32_62 = arith.constant 0 : i32
      %c0_i32_63 = arith.constant 0 : i32
      %113 = tpu.memref_slice %arg3[%112, %c0_i32_63] : memref<512x128xf32, #tpu.memory_space<any>> -> memref<1x128xf32, #tpu.memory_space<any>>
      %114 = tpu.memref_squeeze %113 : memref<1x128xf32, #tpu.memory_space<any>> -> memref<128xf32, #tpu.memory_space<any>>
      %c0_i32_64 = arith.constant 0 : i32
      %115 = tpu.memref_slice %arg7[%c0_i32_61, %c0_i32_64] : memref<8x128xf32, #tpu.memory_space<vmem>> -> memref<1x128xf32, #tpu.memory_space<vmem>>
      %116 = tpu.memref_squeeze %115 : memref<1x128xf32, #tpu.memory_space<vmem>> -> memref<128xf32, #tpu.memory_space<vmem>>
      %117 = tpu.memref_slice %arg10[%c0_i32_62] : memref<8x!tpu.dma_semaphore, #tpu.memory_space<semaphore_mem>> -> memref<1x!tpu.dma_semaphore, #tpu.memory_space<semaphore_mem>>
      %118 = tpu.memref_squeeze %117 : memref<1x!tpu.dma_semaphore, #tpu.memory_space<semaphore_mem>> -> memref<!tpu.dma_semaphore, #tpu.memory_space<semaphore_mem>>
      tpu.wait_dma2 semaphore(%118 : memref<!tpu.dma_semaphore, #tpu.memory_space<semaphore_mem>>) src(%114 : memref<128xf32, #tpu.memory_space<any>>) dst(%116 : memref<128xf32, #tpu.memory_space<vmem>>)
      %c1_i32_65 = arith.constant 1 : i32
      %119 = arith.addi %33, %c1_i32_65 : i32
      %120 = arith.index_cast %119 : i32 to index
      %121 = memref.load %arg2[%120] : memref<8xi32, #tpu.memory_space<smem>>
      %c1_i32_66 = arith.constant 1 : i32
      %c1_i32_67 = arith.constant 1 : i32
      %c0_i32_68 = arith.constant 0 : i32
      %122 = tpu.memref_slice %arg3[%121, %c0_i32_68] : memref<512x128xf32, #tpu.memory_space<any>> -> memref<1x128xf32, #tpu.memory_space<any>>
      %123 = tpu.memref_squeeze %122 : memref<1x128xf32, #tpu.memory_space<any>> -> memref<128xf32, #tpu.memory_space<any>>
      %c0_i32_69 = arith.constant 0 : i32
      %124 = tpu.memref_slice %arg7[%c1_i32_66, %c0_i32_69] : memref<8x128xf32, #tpu.memory_space<vmem>> -> memref<1x128xf32, #tpu.memory_space<vmem>>
      %125 = tpu.memref_squeeze %124 : memref<1x128xf32, #tpu.memory_space<vmem>> -> memref<128xf32, #tpu.memory_space<vmem>>
      %126 = tpu.memref_slice %arg10[%c1_i32_67] : memref<8x!tpu.dma_semaphore, #tpu.memory_space<semaphore_mem>> -> memref<1x!tpu.dma_semaphore, #tpu.memory_space<semaphore_mem>>
      %127 = tpu.memref_squeeze %126 : memref<1x!tpu.dma_semaphore, #tpu.memory_space<semaphore_mem>> -> memref<!tpu.dma_semaphore, #tpu.memory_space<semaphore_mem>>
      tpu.wait_dma2 semaphore(%127 : memref<!tpu.dma_semaphore, #tpu.memory_space<semaphore_mem>>) src(%123 : memref<128xf32, #tpu.memory_space<any>>) dst(%125 : memref<128xf32, #tpu.memory_space<vmem>>)
      %c2_i32_70 = arith.constant 2 : i32
      %128 = arith.addi %33, %c2_i32_70 : i32
      %129 = arith.index_cast %128 : i32 to index
      %130 = memref.load %arg2[%129] : memref<8xi32, #tpu.memory_space<smem>>
      %c2_i32_71 = arith.constant 2 : i32
      %c2_i32_72 = arith.constant 2 : i32
      %c0_i32_73 = arith.constant 0 : i32
      %131 = tpu.memref_slice %arg3[%130, %c0_i32_73] : memref<512x128xf32, #tpu.memory_space<any>> -> memref<1x128xf32, #tpu.memory_space<any>>
      %132 = tpu.memref_squeeze %131 : memref<1x128xf32, #tpu.memory_space<any>> -> memref<128xf32, #tpu.memory_space<any>>
      %c0_i32_74 = arith.constant 0 : i32
      %133 = tpu.memref_slice %arg7[%c2_i32_71, %c0_i32_74] : memref<8x128xf32, #tpu.memory_space<vmem>> -> memref<1x128xf32, #tpu.memory_space<vmem>>
      %134 = tpu.memref_squeeze %133 : memref<1x128xf32, #tpu.memory_space<vmem>> -> memref<128xf32, #tpu.memory_space<vmem>>
      %135 = tpu.memref_slice %arg10[%c2_i32_72] : memref<8x!tpu.dma_semaphore, #tpu.memory_space<semaphore_mem>> -> memref<1x!tpu.dma_semaphore, #tpu.memory_space<semaphore_mem>>
      %136 = tpu.memref_squeeze %135 : memref<1x!tpu.dma_semaphore, #tpu.memory_space<semaphore_mem>> -> memref<!tpu.dma_semaphore, #tpu.memory_space<semaphore_mem>>
      tpu.wait_dma2 semaphore(%136 : memref<!tpu.dma_semaphore, #tpu.memory_space<semaphore_mem>>) src(%132 : memref<128xf32, #tpu.memory_space<any>>) dst(%134 : memref<128xf32, #tpu.memory_space<vmem>>)
      %c3_i32_75 = arith.constant 3 : i32
      %137 = arith.addi %33, %c3_i32_75 : i32
      %138 = arith.index_cast %137 : i32 to index
      %139 = memref.load %arg2[%138] : memref<8xi32, #tpu.memory_space<smem>>
      %c3_i32_76 = arith.constant 3 : i32
      %c3_i32_77 = arith.constant 3 : i32
      %c0_i32_78 = arith.constant 0 : i32
      %140 = tpu.memref_slice %arg3[%139, %c0_i32_78] : memref<512x128xf32, #tpu.memory_space<any>> -> memref<1x128xf32, #tpu.memory_space<any>>
      %141 = tpu.memref_squeeze %140 : memref<1x128xf32, #tpu.memory_space<any>> -> memref<128xf32, #tpu.memory_space<any>>
      %c0_i32_79 = arith.constant 0 : i32
      %142 = tpu.memref_slice %arg7[%c3_i32_76, %c0_i32_79] : memref<8x128xf32, #tpu.memory_space<vmem>> -> memref<1x128xf32, #tpu.memory_space<vmem>>
      %143 = tpu.memref_squeeze %142 : memref<1x128xf32, #tpu.memory_space<vmem>> -> memref<128xf32, #tpu.memory_space<vmem>>
      %144 = tpu.memref_slice %arg10[%c3_i32_77] : memref<8x!tpu.dma_semaphore, #tpu.memory_space<semaphore_mem>> -> memref<1x!tpu.dma_semaphore, #tpu.memory_space<semaphore_mem>>
      %145 = tpu.memref_squeeze %144 : memref<1x!tpu.dma_semaphore, #tpu.memory_space<semaphore_mem>> -> memref<!tpu.dma_semaphore, #tpu.memory_space<semaphore_mem>>
      tpu.wait_dma2 semaphore(%145 : memref<!tpu.dma_semaphore, #tpu.memory_space<semaphore_mem>>) src(%141 : memref<128xf32, #tpu.memory_space<any>>) dst(%143 : memref<128xf32, #tpu.memory_space<vmem>>)
      %c4_i32_80 = arith.constant 4 : i32
      %146 = arith.addi %33, %c4_i32_80 : i32
      %147 = arith.index_cast %146 : i32 to index
      %148 = memref.load %arg2[%147] : memref<8xi32, #tpu.memory_space<smem>>
      %c4_i32_81 = arith.constant 4 : i32
      %c4_i32_82 = arith.constant 4 : i32
      %c0_i32_83 = arith.constant 0 : i32
      %149 = tpu.memref_slice %arg3[%148, %c0_i32_83] : memref<512x128xf32, #tpu.memory_space<any>> -> memref<1x128xf32, #tpu.memory_space<any>>
      %150 = tpu.memref_squeeze %149 : memref<1x128xf32, #tpu.memory_space<any>> -> memref<128xf32, #tpu.memory_space<any>>
      %c0_i32_84 = arith.constant 0 : i32
      %151 = tpu.memref_slice %arg7[%c4_i32_81, %c0_i32_84] : memref<8x128xf32, #tpu.memory_space<vmem>> -> memref<1x128xf32, #tpu.memory_space<vmem>>
      %152 = tpu.memref_squeeze %151 : memref<1x128xf32, #tpu.memory_space<vmem>> -> memref<128xf32, #tpu.memory_space<vmem>>
      %153 = tpu.memref_slice %arg10[%c4_i32_82] : memref<8x!tpu.dma_semaphore, #tpu.memory_space<semaphore_mem>> -> memref<1x!tpu.dma_semaphore, #tpu.memory_space<semaphore_mem>>
      %154 = tpu.memref_squeeze %153 : memref<1x!tpu.dma_semaphore, #tpu.memory_space<semaphore_mem>> -> memref<!tpu.dma_semaphore, #tpu.memory_space<semaphore_mem>>
      tpu.wait_dma2 semaphore(%154 : memref<!tpu.dma_semaphore, #tpu.memory_space<semaphore_mem>>) src(%150 : memref<128xf32, #tpu.memory_space<any>>) dst(%152 : memref<128xf32, #tpu.memory_space<vmem>>)
      %c5_i32_85 = arith.constant 5 : i32
      %155 = arith.addi %33, %c5_i32_85 : i32
      %156 = arith.index_cast %155 : i32 to index
      %157 = memref.load %arg2[%156] : memref<8xi32, #tpu.memory_space<smem>>
      %c5_i32_86 = arith.constant 5 : i32
      %c5_i32_87 = arith.constant 5 : i32
      %c0_i32_88 = arith.constant 0 : i32
      %158 = tpu.memref_slice %arg3[%157, %c0_i32_88] : memref<512x128xf32, #tpu.memory_space<any>> -> memref<1x128xf32, #tpu.memory_space<any>>
      %159 = tpu.memref_squeeze %158 : memref<1x128xf32, #tpu.memory_space<any>> -> memref<128xf32, #tpu.memory_space<any>>
      %c0_i32_89 = arith.constant 0 : i32
      %160 = tpu.memref_slice %arg7[%c5_i32_86, %c0_i32_89] : memref<8x128xf32, #tpu.memory_space<vmem>> -> memref<1x128xf32, #tpu.memory_space<vmem>>
      %161 = tpu.memref_squeeze %160 : memref<1x128xf32, #tpu.memory_space<vmem>> -> memref<128xf32, #tpu.memory_space<vmem>>
      %162 = tpu.memref_slice %arg10[%c5_i32_87] : memref<8x!tpu.dma_semaphore, #tpu.memory_space<semaphore_mem>> -> memref<1x!tpu.dma_semaphore, #tpu.memory_space<semaphore_mem>>
      %163 = tpu.memref_squeeze %162 : memref<1x!tpu.dma_semaphore, #tpu.memory_space<semaphore_mem>> -> memref<!tpu.dma_semaphore, #tpu.memory_space<semaphore_mem>>
      tpu.wait_dma2 semaphore(%163 : memref<!tpu.dma_semaphore, #tpu.memory_space<semaphore_mem>>) src(%159 : memref<128xf32, #tpu.memory_space<any>>) dst(%161 : memref<128xf32, #tpu.memory_space<vmem>>)
      %c6_i32_90 = arith.constant 6 : i32
      %164 = arith.addi %33, %c6_i32_90 : i32
      %165 = arith.index_cast %164 : i32 to index
      %166 = memref.load %arg2[%165] : memref<8xi32, #tpu.memory_space<smem>>
      %c6_i32_91 = arith.constant 6 : i32
      %c6_i32_92 = arith.constant 6 : i32
      %c0_i32_93 = arith.constant 0 : i32
      %167 = tpu.memref_slice %arg3[%166, %c0_i32_93] : memref<512x128xf32, #tpu.memory_space<any>> -> memref<1x128xf32, #tpu.memory_space<any>>
      %168 = tpu.memref_squeeze %167 : memref<1x128xf32, #tpu.memory_space<any>> -> memref<128xf32, #tpu.memory_space<any>>
      %c0_i32_94 = arith.constant 0 : i32
      %169 = tpu.memref_slice %arg7[%c6_i32_91, %c0_i32_94] : memref<8x128xf32, #tpu.memory_space<vmem>> -> memref<1x128xf32, #tpu.memory_space<vmem>>
      %170 = tpu.memref_squeeze %169 : memref<1x128xf32, #tpu.memory_space<vmem>> -> memref<128xf32, #tpu.memory_space<vmem>>
      %171 = tpu.memref_slice %arg10[%c6_i32_92] : memref<8x!tpu.dma_semaphore, #tpu.memory_space<semaphore_mem>> -> memref<1x!tpu.dma_semaphore, #tpu.memory_space<semaphore_mem>>
      %172 = tpu.memref_squeeze %171 : memref<1x!tpu.dma_semaphore, #tpu.memory_space<semaphore_mem>> -> memref<!tpu.dma_semaphore, #tpu.memory_space<semaphore_mem>>
      tpu.wait_dma2 semaphore(%172 : memref<!tpu.dma_semaphore, #tpu.memory_space<semaphore_mem>>) src(%168 : memref<128xf32, #tpu.memory_space<any>>) dst(%170 : memref<128xf32, #tpu.memory_space<vmem>>)
      %c7_i32_95 = arith.constant 7 : i32
      %173 = arith.addi %33, %c7_i32_95 : i32
      %174 = arith.index_cast %173 : i32 to index
      %175 = memref.load %arg2[%174] : memref<8xi32, #tpu.memory_space<smem>>
      %c7_i32_96 = arith.constant 7 : i32
      %c7_i32_97 = arith.constant 7 : i32
      %c0_i32_98 = arith.constant 0 : i32
      %176 = tpu.memref_slice %arg3[%175, %c0_i32_98] : memref<512x128xf32, #tpu.memory_space<any>> -> memref<1x128xf32, #tpu.memory_space<any>>
      %177 = tpu.memref_squeeze %176 : memref<1x128xf32, #tpu.memory_space<any>> -> memref<128xf32, #tpu.memory_space<any>>
      %c0_i32_99 = arith.constant 0 : i32
      %178 = tpu.memref_slice %arg7[%c7_i32_96, %c0_i32_99] : memref<8x128xf32, #tpu.memory_space<vmem>> -> memref<1x128xf32, #tpu.memory_space<vmem>>
      %179 = tpu.memref_squeeze %178 : memref<1x128xf32, #tpu.memory_space<vmem>> -> memref<128xf32, #tpu.memory_space<vmem>>
      %180 = tpu.memref_slice %arg10[%c7_i32_97] : memref<8x!tpu.dma_semaphore, #tpu.memory_space<semaphore_mem>> -> memref<1x!tpu.dma_semaphore, #tpu.memory_space<semaphore_mem>>
      %181 = tpu.memref_squeeze %180 : memref<1x!tpu.dma_semaphore, #tpu.memory_space<semaphore_mem>> -> memref<!tpu.dma_semaphore, #tpu.memory_space<semaphore_mem>>
      tpu.wait_dma2 semaphore(%181 : memref<!tpu.dma_semaphore, #tpu.memory_space<semaphore_mem>>) src(%177 : memref<128xf32, #tpu.memory_space<any>>) dst(%179 : memref<128xf32, #tpu.memory_space<vmem>>)
    } else {
    }
    %c0 = arith.constant 0 : index
    %c0_1 = arith.constant 0 : index
    %3 = vector.load %arg7[%c0, %c0_1] : memref<8x128xf32, #tpu.memory_space<vmem>>, vector<8x128xf32>
    %c0_2 = arith.constant 0 : index
    %c0_3 = arith.constant 0 : index
    %4 = vector.load %arg4[%c0_2, %c0_3] : memref<128x256xf32, #tpu.memory_space<vmem>>, vector<128x256xf32>
    %cst = arith.constant dense<0.000000e+00> : vector<8x256xf32>
    %5 = tpu.matmul %3, %4, %cst {dimension_numbers = #tpu.dot_dimension_numbers<[1], [0], [0], [1], [0, 0, 1, 1], [], []>} : vector<8x128xf32>, vector<128x256xf32>, vector<8x256xf32> -> vector<8x256xf32>
    %c0_4 = arith.constant 0 : index
    %c0_5 = arith.constant 0 : index
    %6 = vector.load %arg5[%c0_4, %c0_5] : memref<1x256xf32, #tpu.memory_space<vmem>>, vector<1x256xf32>
    %7 = vector.broadcast %6 : vector<1x256xf32> to vector<8x256xf32>
    %8 = arith.addf %5, %7 : vector<8x256xf32>
    %c256_i32 = arith.constant 256 : i32
    %9 = arith.muli %arg1, %c256_i32 : i32
    %10 = tpu.assume_multiple %9, 128 : i32
    %c0_6 = arith.constant 0 : index
    %11 = arith.index_cast %10 : i32 to index
    %12 = vector.load %arg6[%c0_6, %11] : memref<8x512xf32, #tpu.memory_space<vmem>>, vector<8x256xf32>
    tpu.vector_store %arg6[%c0_6, %11], %8 {strides = array<i32>} : memref<8x512xf32, #tpu.memory_space<vmem>>, vector<8x256xf32>,
    %cst_7 = arith.constant dense<0xFF800000> : vector<8xf32>
    %13 = vector.multi_reduction <maximumf>, %8, %cst_7 [1] : vector<8x256xf32> to vector<8xf32>
    %14 = vector.shape_cast %13 : vector<8xf32> to vector<8x1xf32>
    %c0_8 = arith.constant 0 : index
    %c0_9 = arith.constant 0 : index
    %15 = vector.load %arg8[%c0_8, %c0_9] : memref<8x1xf32, #tpu.memory_space<vmem>>, vector<8x1xf32>
    %16 = arith.maximumf %15, %14 : vector<8x1xf32>
    %c0_10 = arith.constant 0 : index
    %c0_11 = arith.constant 0 : index
    %17 = vector.load %arg8[%c0_10, %c0_11] : memref<8x1xf32, #tpu.memory_space<vmem>>, vector<8x1xf32>
    %18 = arith.subf %17, %16 : vector<8x1xf32>
    %19 = math.exp %18 : vector<8x1xf32>
    %c0_12 = arith.constant 0 : index
    %c0_13 = arith.constant 0 : index
    %20 = vector.load %arg9[%c0_12, %c0_13] : memref<8x1xf32, #tpu.memory_space<vmem>>, vector<8x1xf32>
    %21 = arith.mulf %19, %20 : vector<8x1xf32>
    %22 = vector.broadcast %16 : vector<8x1xf32> to vector<8x256xf32>
    %23 = arith.subf %8, %22 : vector<8x256xf32>
    %24 = math.exp %23 : vector<8x256xf32>
    %cst_14 = arith.constant dense<0.000000e+00> : vector<8xf32>
    %25 = vector.multi_reduction <add>, %24, %cst_14 [1] : vector<8x256xf32> to vector<8xf32>
    %26 = vector.shape_cast %25 : vector<8xf32> to vector<8x1xf32>
    %27 = arith.addf %21, %26 : vector<8x1xf32>
    %c0_15 = arith.constant 0 : index
    %c0_16 = arith.constant 0 : index
    %28 = vector.load %arg9[%c0_15, %c0_16] : memref<8x1xf32, #tpu.memory_space<vmem>>, vector<8x1xf32>
    tpu.vector_store %arg9[%c0_15, %c0_16], %27 {strides = array<i32>} : memref<8x1xf32, #tpu.memory_space<vmem>>, vector<8x1xf32>,
    %c0_17 = arith.constant 0 : index
    %c0_18 = arith.constant 0 : index
    %29 = vector.load %arg8[%c0_17, %c0_18] : memref<8x1xf32, #tpu.memory_space<vmem>>, vector<8x1xf32>
    tpu.vector_store %arg8[%c0_17, %c0_18], %16 {strides = array<i32>} : memref<8x1xf32, #tpu.memory_space<vmem>>, vector<8x1xf32>,
    %c1_i32 = arith.constant 1 : i32
    %30 = arith.cmpi eq, %arg1, %c1_i32 : i32
    %31 = arith.extui %30 : i1 to i32
    %c0_i32_19 = arith.constant 0 : i32
    %32 = arith.cmpi ne, %31, %c0_i32_19 : i32
    scf.if %32 {
      %c0_20 = arith.constant 0 : index
      %c0_21 = arith.constant 0 : index
      %33 = vector.load %arg8[%c0_20, %c0_21] : memref<8x1xf32, #tpu.memory_space<vmem>>, vector<8x1xf32>
      %c0_22 = arith.constant 0 : index
      %c0_23 = arith.constant 0 : index
      %34 = vector.load %arg9[%c0_22, %c0_23] : memref<8x1xf32, #tpu.memory_space<vmem>>, vector<8x1xf32>
      %35 = math.log %34 : vector<8x1xf32>
      %36 = arith.addf %33, %35 : vector<8x1xf32>
      %c0_24 = arith.constant 0 : index
      %c0_25 = arith.constant 0 : index
      %37 = vector.load %arg6[%c0_24, %c0_25] : memref<8x512xf32, #tpu.memory_space<vmem>>, vector<8x512xf32>
      %38 = vector.broadcast %36 : vector<8x1xf32> to vector<8x512xf32>
      %39 = arith.subf %37, %38 : vector<8x512xf32>
      %c0_26 = arith.constant 0 : index
      %c0_27 = arith.constant 0 : index
      %40 = vector.load %arg6[%c0_26, %c0_27] : memref<8x512xf32, #tpu.memory_space<vmem>>, vector<8x512xf32>
      tpu.vector_store %arg6[%c0_26, %c0_27], %39 {strides = array<i32>} : memref<8x512xf32, #tpu.memory_space<vmem>>, vector<8x512xf32>,
    } else {
    }
    return
  }
  func.func @transform_1(%arg0: i32, %arg1: i32, %arg2: memref<8xi32, #tpu.memory_space<smem>>) -> (i32, i32) {
    %c0_i32 = arith.constant 0 : i32
    %c0_i32_0 = arith.constant 0 : i32
    return %c0_i32, %arg1 : i32, i32
  }
  func.func @transform_2(%arg0: i32, %arg1: i32, %arg2: memref<8xi32, #tpu.memory_space<smem>>) -> (i32, i32) {
    %c0_i32 = arith.constant 0 : i32
    %c0_i32_0 = arith.constant 0 : i32
    return %c0_i32, %arg1 : i32, i32
  }
  func.func @transform_3(%arg0: i32, %arg1: i32, %arg2: memref<8xi32, #tpu.memory_space<smem>>) -> (i32, i32) {
    %c0_i32 = arith.constant 0 : i32
    %c0_i32_0 = arith.constant 0 : i32
    return %arg0, %c0_i32 : i32, i32
  }
}

</mosaic_0001>

<bundles_post_ra>
// kernel: tpu_custom_call.1
= control target key start
LH: loop header
LB: loop body
LE: loop exit
PB: predicated region body
PF: predicated region fallthrough
CT: control target
= control target key end

     0   :  { %s1677_s0 = inlined_call_operand.hbm [shape: s32[8], index: 0, kind: input, shape index: {}]   ;;  %s1678_s1 = inlined_call_operand.hbm [shape: f32[512,128], index: 1, kind: input, shape index: {}]   ;;  %s1679_s2 = inlined_call_operand.hbm [shape: f32[128,512], index: 2, kind: input, shape index: {}]   ;;  %s1680_s3 = inlined_call_operand.hbm [shape: f32[1,512], index: 3, kind: input, shape index: {}]   ;;  %s1681_s4 = inlined_call_operand.hbm [shape: f32[8,512], index: 4, kind: output, shape index: {}]  }
   0x1   :  { %1684 = sst [smem:[#allocation44_spill]] %s1679_s2  ;;  %s893_s17 = scalar_lea.hbm %s1677_s0, 16 }
   0x2   :  { %p894_p0 = scmp.ne.s32.totalorder %s1677_s0, %s893_s17  ;;  %p897_p1 = scmp.lt.u32.totalorder %s893_s17, %s1677_s0 }
   0x4   :  { %p899_p2 = pnand %p897_p1, %p894_p0 }
   0x6   :  { %902 = shalt.err (!%p899_p2)  }
   0x7   :  { %s1259_s22 = smov [#allocation7]  }
   0x8   :  { %10 = dma.hbm_to_smem %s1677_s0, 16, %s1259_s22, [#allocation6] }
   0x9   :  { %1205 = dma.done.wait [#allocation6], 16 }
   0xa   :  { %1206 = vsyncadd [#allocation6], 4294967280 }
   0xb   :  { %12 = sfence }
   0xc   :  { %13 = vsyncpa [#allocation9], 0 }
   0xd   :  { %15 = vsyncpa [#allocation9 + $0x1], 0 }
   0xe   :  { %16 = vsyncpa [#allocation12], 0 }
   0xf   :  { %18 = vsyncpa [#allocation12 + $0x1], 0 }
  0x10   :  { %19 = vsyncpa [#allocation10], 0  ;;  %s1316_s25 = smov 0   ;;  %s1318_s26 = smov 0  }
  0x11   :  { %s1320_s27 = smov 0   ;;  %s1322_s28 = smov 0  }
  0x12   :  { %s1324_s29 = smov 0   ;;  %s1326_s30 = smov 0  }
  0x13 LB: > { %s1683_s0 = sadd.s32 4294967295, %s1257_s30   ;;  %s34_s5 = sadd.s32 1, %s1253_s29  ;;  %s1257_s30 = sphi %s1326_s30, %s25_s30   ;;  %s1253_s29 = sphi %s1324_s29, %s1699_s29   ;;  %s1249_s28 = sphi %s1322_s28, %s1698_s28   ;;  %s1245_s27 = sphi %s1320_s27, %s1697_s27   ;;  %s1241_s26 = sphi %s1318_s26, %s1696_s26   ;;  %s1237_s25 = sphi %s1316_s25, %s1695_s25  }
  0x14   : > { %p35_p3 = scmp.ge.s32.totalorder %s34_s5, 2  ;;  %s44_s6 = sadd.s32 1, %s1245_s27 }
  0x15   : > { %p51_p4 = scmp.ne.s32.totalorder %s1245_s27, %s1241_s26  ;;  %p52_p5 = scmp.eq.s32.totalorder %s1257_s30, 0 }
  0x16   : > { %s1701_s5 = smov (%p35_p3, %s34_s5), 0  ;;  %p57_p7 = scmp.ne.s32.totalorder %s1241_s26, %s1237_s25 }
  0x17   : > { %p1352_p6 = por %p52_p5, %p51_p4  ;;  %s41_s8 = ssub.s32 %s1253_s29, %s1701_s5 }
  0x18   : > { %p58_p8 = scmp.eq.s32.totalorder %s1683_s0, 0  ;;  %p42_p9 = scmp.eq.s32.totalorder %s41_s8, 0 }
  0x19   : > { %p814_p11 = scmp.lt.s32.totalorder %s1257_s30, 2  ;;  %s1370_s11 = sand.u32 1, %s1245_s27  }
  0x1a   : > { %p1361_p10 = por %p58_p8, %p57_p7  ;;  %s765_s12 = sshll.u32 %s1253_s29, 8 }
  0x1b   : > { %s1367_s10 = scalar_select %p42_p9, %s1245_s27, %s44_s6  }
  0x1c   : > { %s1686_s9 = scalar_select %p1361_p10, 1, 0 }
  0x1d   : > { %s725_s13 = sshll.u32 %s1370_s11, 8  ;;  %s1687_s2 = sld [smem:[#allocation44_spill]] }
  0x1e   : > { %s137_s17 = scalar_lea.vmem [#allocation8], %s725_s13  ;;  %p1381_p12 = pnand %p814_p11, %p1352_p6 }
  0x1f   : > { %s144_s18 = sshll.u32 %s137_s17, 4  ;;  %s134_s20 = scalar_lea.sflag [#allocation9], %s1370_s11  ;;  %s1385_s18 = int_to_ptr.vmem [resolvable:$true] %s144_s18 }
  0x20   : > { %p905_p1 = pneg %p1381_p12 }
  0x23   : > { %s1377_s16 = scalar_lea.hbm %s1687_s2, %s765_s12  ;;  %s908_s24 = scalar_lea.hbm %s1687_s2, 8192 }
  0x24   : > { %s903_s21 = scalar_lea.hbm %s1377_s16, 4096  ;;  %p909_p4 = scmp.lt.u32.totalorder %s1377_s16, %s1687_s2 }
  0x25   : > { %p904_p0 = scmp.ne.s32.totalorder %s1377_s16, %s903_s21  ;;  %p910_p5 = scmp.lt.u32.totalorder %s908_s24, %s903_s21 }
  0x26   : > { %p912_p7 = scmp.lt.u32.totalorder %s903_s21, %s1377_s16 }
  0x27   : > { %p906_p2 = pnand %p905_p1, %p904_p0  ;;  %p911_p6 = por %p910_p5, %p909_p4 }
  0x29   : > { %p907_p3 = pneg %p906_p2  ;;  %p913_p8 = por %p912_p7, %p911_p6 }
  0x2b   : > { %p914_p9 = pnand %p913_p8, %p907_p3 }
  0x2d   : > { %917 = shalt.err (!%p914_p9)
}
  0x2e   : > { %s918_s7 = scalar_lea.vmem %s1385_s18, 4096  ;;  %s1260_s8 = smov [#allocation8]  }
  0x2f   : > { %p919_p11 = scmp.ne.s32.totalorder %s1385_s18, %s918_s7  ;;  %s923_s12 = sshll.u32 %s1260_s8, 4  ;;  %s924_s12 = int_to_ptr.vmem [resolvable:$false] %s923_s12 }
  0x30   : > { %s925_s13 = scalar_lea.vmem %s924_s12, 8192  ;;  %p926_p13 = scmp.lt.s32.totalorder %s1385_s18, %s924_s12 }
  0x31   : > { %p921_p0 = pnand %p919_p11, %p905_p1  ;;  %p927_p4 = scmp.lt.s32.totalorder %s925_s13, %s918_s7 }
  0x33   : > { %p922_p2 = pneg %p921_p0  ;;  %p928_p5 = por %p927_p4, %p926_p13 }
  0x35   : > { %p929_p6 = pnand %p928_p5, %p922_p2 }
  0x37   : > { %932 = shalt.err (!%p929_p6)
}
  0x38   : > { %s1261_s14 = smov 512   ;;  %s1262_s15 = smov 256  }
  0x39   : > { %s1263_s17 = smov 16   ;;  %p171_p3 = scmp.lt.s32.totalorder %s1257_s30, 3 }
  0x3a   : > { %810 = dma.hbm_to_vmem [thread:$0]  (!%p1381_p12), %s1377_s16, 4096, %s1385_s18, %s134_s20, %s1261_s14, %s1262_s15, %s1263_s17  }
  0x3b   : > { %s728_s21 = sshll.u32 %s1370_s11, 1  ;;  %s766_s22 = sshll.u32 %s1253_s29, 5 }
  0x3c   : > { %p1689_p13 = scmp.ge.s32.totalorder %s1257_s30, 1  ;;  %s1428_s6 = scalar_lea.hbm %s1680_s3, %s766_s22 }
  0x3d   : > { %s158_s7 = scalar_lea.vmem [#allocation11], %s728_s21  ;;  %s155_s16 = scalar_lea.sflag [#allocation12], %s1370_s11 }
  0x3e   : > { %p1421_p7 = pnand %p1689_p13, %p171_p3  ;;  %s166_s8 = sshll.u32 %s158_s7, 4  ;;  %s167_s8 = int_to_ptr.vmem [resolvable:$true] %s166_s8 }
  0x3f   : > { %s933_s18 = scalar_lea.hbm %s1428_s6, 32  ;;  %s938_s13 = scalar_lea.hbm %s1680_s3, 64 }
  0x40   : > { %s1690_s23 = scalar_select %p1421_p7, 1, 0 }
  0x41   : > { %p934_p8 = scmp.ne.s32.totalorder %s1428_s6, %s933_s18  ;;  %p939_p0 = scmp.lt.u32.totalorder %s1428_s6, %s1680_s3 }
  0x42   : > { %p940_p2 = scmp.lt.u32.totalorder %s938_s13, %s933_s18  ;;  %p942_p5 = scmp.lt.u32.totalorder %s933_s18, %s1428_s6 }
  0x43   : > { %p936_p9 = pnand %p934_p8, %p905_p1 }
  0x44   : > { %p941_p4 = por %p940_p2, %p939_p0 }
  0x45   : > { %p937_p11 = pneg %p936_p9 }
  0x46   : > { %p943_p6 = por %p942_p5, %p941_p4 }
  0x48   : > { %p944_p3 = pnand %p943_p6, %p937_p11 }
  0x4a   : > { %947 = shalt.err (!%p944_p3)
}
  0x4b   : > { %s948_s11 = scalar_lea.vmem %s167_s8, 32  ;;  %s1264_s17 = smov [#allocation11]  }
  0x4c   : > { %p949_p13 = scmp.ne.s32.totalorder %s167_s8, %s948_s11  ;;  %s953_s21 = sshll.u32 %s1264_s17, 4  ;;  %s954_s21 = int_to_ptr.vmem [resolvable:$false] %s953_s21 }
  0x4d   : > { %s955_s22 = scalar_lea.vmem %s954_s21, 64  ;;  %p956_p10 = scmp.lt.s32.totalorder %s167_s8, %s954_s21 }
  0x4e   : > { %p951_p8 = pnand %p949_p13, %p905_p1  ;;  %p957_p7 = scmp.lt.s32.totalorder %s955_s22, %s948_s11 }
  0x50   : > { %p952_p9 = pneg %p951_p8  ;;  %p958_p0 = por %p957_p7, %p956_p10 }
  0x52   : > { %p959_p2 = pnand %p958_p0, %p952_p9 }
  0x54   : > { %962 = shalt.err (!%p959_p2)
}
  0x55   : > { %813 = dma.hbm_to_vmem [thread:$0]  (!%p1381_p12), %s1428_s6, 32, %s167_s8, %s155_s16  }
  0x56   : > { %p1691_p11 = scmp.ne.s32.totalorder %s1690_s23, 0 }
  0x57   : > { %s177_s24 = sand.u32 (!%p1691_p11), 1, %s1241_s26   ;;  %p1692_p1 = scmp.ne.s32.totalorder (!%p1691_p11), %s1686_s9, 0 }
  0x58   : > { %175 = sbr.rel (%p1691_p11) target bundleno = 1159 (0x487), region = 28  ;;  %s732_s25 = sshll.u32 (!%p1691_p11), %s177_s24, 8 }
  0x59   : > { %s178_s7 = scalar_lea.sflag (!%p1691_p11), [#allocation9], %s177_s24  ;;  %s1453_s18 = scalar_lea.vmem (!%p1691_p11), [#allocation8], %s732_s25 }
  0x5f   : > { %1208 = dma.done.wait (%p1692_p1), %s178_s7, 4096  }
  0x60   : > { %1210 = vsyncadd (%p1692_p1), %s178_s7, 4294963200  ;;  %s733_s20 = sshll.u32 %s177_s24, 1  ;;  %s187_s19 = scalar_lea.sflag [#allocation12], %s177_s24 }
  0x61   : > { %s1459_s12 = scalar_lea.vmem [#allocation11], %s733_s20 }
  0x62   : > { %1212 = dma.done.wait (%p1692_p1), %s187_s19, 32  }
  0x63   : > { %1214 = vsyncadd (%p1692_p1), %s187_s19, 4294967264  ;;  %p734_p10 = scmp.ne.s32.totalorder %s1249_s28, 0 }
  0x64   : > { %s218_s23 = sld [smem:[#allocation7]] (!%p734_p10)  ;;  %vm351_vm0 = vcmask (!%p734_p10), 7168   ;;  %s1265_s6 = smov (!%p734_p10), [#allocation2]   ;;  %v1266_v0 = vmov (!%p734_p10), -inf   ;;  %v1267_v1 = vmov (!%p734_p10), 0.0  }
  0x65   : > { %216 = sbr.rel (%p734_p10) target bundleno = 293 (0x125), region = 40  ;;  %s228_s8 = sshll.u32 (!%p734_p10), %s1265_s6, 4  ;;  %352 = vst.msk [vmem:[#allocation3] sm:$0xff] (!%p734_p10), %vm351_vm0, %v1266_v0  ;;  %353 = vst.msk [vmem:[#allocation4] sm:$0xff] (!%p734_p10), %vm351_vm0, %v1267_v1  ;;  %s1468_s8 = int_to_ptr.vmem [resolvable:$true] %s228_s8 }
  0x66   : > { %s1466_s16 = sld [smem:[#allocation7 + $0x1]] (!%p734_p10)  ;;  %s1268_s13 = smov (!%p734_p10), [#allocation2 + $0x1]  }
  0x67   : > { %s245_s14 = sshll.u32 (!%p734_p10), %s1268_s13, 4  ;;  %s1470_s9 = sld [smem:[#allocation7 + $0x2]] (!%p734_p10)  ;;  %s1472_s14 = int_to_ptr.vmem [resolvable:$true] %s245_s14 }
  0x68   : > { %s1269_s15 = smov (!%p734_p10), [#allocation2 + $0x2]   ;;  %s1474_s17 = sld [smem:[#allocation7 + $0x3]] (!%p734_p10) }
  0x69   : > { %s262_s11 = sshll.u32 (!%p734_p10), %s1269_s15, 4  ;;  %s1485_s13 = scalar_lea.hbm (!%p734_p10), %s1678_s1, 8192  ;;  %s1476_s11 = int_to_ptr.vmem [resolvable:$true] %s262_s11 }
  0x6a   : > { %s735_s21 = sshll.u32 (!%p734_p10), %s218_s23, 4 }
  0x6b   : > { %s220_s25 = scalar_lea.hbm (!%p734_p10), %s1678_s1, %s735_s21 }
  0x6c   : > { %s737_s7 = sshll.u32 %s1466_s16, 4  ;;  %s963_s20 = scalar_lea.hbm %s220_s25, 16 }
  0x6d   : > { %p964_p12 = scmp.ne.s32.totalorder %s220_s25, %s963_s20  ;;  %p966_p7 = scmp.lt.u32.totalorder %s220_s25, %s1678_s1 }
  0x6e   : > { %p967_p4 = scmp.lt.u32.totalorder %s1485_s13, %s963_s20  ;;  %p969_p6 = scmp.lt.u32.totalorder %s963_s20, %s220_s25 }
  0x70   : > { %p968_p5 = por %p967_p4, %p966_p7 }
  0x72   : > { %p970_p3 = por %p969_p6, %p968_p5 }
  0x74   : > { %p971_p13 = pnand %p970_p3, %p964_p12 }
  0x76   : > { %974 = shalt.err (!%p971_p13)  }
  0x77   : > { %s975_s23 = scalar_lea.vmem %s1468_s8, 16  ;;  %s1494_s16 = scalar_lea.vmem %s1468_s8, 128 }
  0x78   : > { %p976_p8 = scmp.ne.s32.totalorder %s1468_s8, %s975_s23  ;;  %p980_p9 = scmp.lt.s32.totalorder %s1468_s8, %s1468_s8 }
  0x79   : > { %p981_p0 = scmp.lt.s32.totalorder %s1494_s16, %s975_s23 }
  0x7b   : > { %p982_p2 = por %p981_p0, %p980_p9 }
  0x7d   : > { %p983_p11 = pnand %p982_p2, %p976_p8 }
  0x7f   : > { %986 = shalt.err (!%p983_p11)  }
  0x80   : > { %231 = dma.hbm_to_vmem [thread:$0]  %s220_s25, 16, %s1468_s8, [#allocation5] }
  0x81   : > { %s235_s15 = scalar_lea.hbm %s1678_s1, %s737_s7  ;;  %s739_s21 = sshll.u32 %s1470_s9, 4 }
  0x82   : > { %s987_s22 = scalar_lea.hbm %s235_s15, 16  ;;  %p990_p10 = scmp.lt.u32.totalorder %s235_s15, %s1678_s1 }
  0x83   : > { %p988_p1 = scmp.ne.s32.totalorder %s235_s15, %s987_s22  ;;  %p991_p12 = scmp.lt.u32.totalorder %s1485_s13, %s987_s22 }
  0x84   : > { %p993_p4 = scmp.lt.u32.totalorder %s987_s22, %s235_s15 }
  0x85   : > { %p992_p7 = por %p991_p12, %p990_p10 }
  0x87   : > { %p994_p5 = por %p993_p4, %p992_p7 }
  0x89   : > { %p995_p6 = pnand %p994_p5, %p988_p1 }
  0x8b   : > { %998 = shalt.err (!%p995_p6)  }
  0x8c   : > { %s999_s25 = scalar_lea.vmem %s1472_s14, 16  ;;  %p1004_p13 = scmp.lt.s32.totalorder %s1472_s14, %s1468_s8 }
  0x8d   : > { %p1000_p3 = scmp.ne.s32.totalorder %s1472_s14, %s999_s25  ;;  %p1005_p8 = scmp.lt.s32.totalorder %s1494_s16, %s999_s25 }
  0x8f   : > { %p1006_p9 = por %p1005_p8, %p1004_p13 }
  0x91   : > { %p1007_p0 = pnand %p1006_p9, %p1000_p3 }
  0x93   : > { %1010 = shalt.err (!%p1007_p0)  }
  0x94   : > { %248 = dma.hbm_to_vmem [thread:$0]  %s235_s15, 16, %s1472_s14, [#allocation5 + $0x1] }
  0x95   : > { %s252_s19 = scalar_lea.hbm %s1678_s1, %s739_s21  ;;  %s741_s6 = sshll.u32 %s1474_s17, 4 }
  0x96   : > { %s1011_s23 = scalar_lea.hbm %s252_s19, 16  ;;  %p1014_p11 = scmp.lt.u32.totalorder %s252_s19, %s1678_s1 }
  0x97   : > { %p1012_p2 = scmp.ne.s32.totalorder %s252_s19, %s1011_s23  ;;  %p1015_p1 = scmp.lt.u32.totalorder %s1485_s13, %s1011_s23 }
  0x98   : > { %p1017_p12 = scmp.lt.u32.totalorder %s1011_s23, %s252_s19 }
  0x99   : > { %p1016_p10 = por %p1015_p1, %p1014_p11 }
  0x9b   : > { %p1018_p7 = por %p1017_p12, %p1016_p10 }
  0x9d   : > { %p1019_p4 = pnand %p1018_p7, %p1012_p2 }
  0x9f   : > { %1022 = shalt.err (!%p1019_p4)  }
  0xa0   : > { %s1023_s14 = scalar_lea.vmem %s1476_s11, 16  ;;  %p1028_p6 = scmp.lt.s32.totalorder %s1476_s11, %s1468_s8 }
  0xa1   : > { %p1024_p5 = scmp.ne.s32.totalorder %s1476_s11, %s1023_s14  ;;  %p1029_p3 = scmp.lt.s32.totalorder %s1494_s16, %s1023_s14 }
  0xa3   : > { %p1030_p13 = por %p1029_p3, %p1028_p6 }
  0xa5   : > { %p1031_p8 = pnand %p1030_p13, %p1024_p5 }
  0xa7   : > { %1034 = shalt.err (!%p1031_p8)  }
  0xa8   : > { %265 = dma.hbm_to_vmem [thread:$0]  %s252_s19, 16, %s1476_s11, [#allocation5 + $0x2] }
  0xa9   : > { %s269_s21 = scalar_lea.hbm %s1678_s1, %s741_s6  ;;  %s1270_s22 = smov [#allocation2 + $0x3]  }
  0xaa   : > { %s279_s24 = sshll.u32 %s1270_s22, 4  ;;  %s1531_s20 = sld [smem:[#allocation7 + $0x4]]  ;;  %s280_s24 = int_to_ptr.vmem [resolvable:$true] %s279_s24 }
  0xab   : > { %s1035_s25 = scalar_lea.hbm %s269_s21, 16  ;;  %p1038_p0 = scmp.lt.u32.totalorder %s269_s21, %s1678_s1 }
  0xac   : > { %p1036_p9 = scmp.ne.s32.totalorder %s269_s21, %s1035_s25  ;;  %p1039_p2 = scmp.lt.u32.totalorder %s1485_s13, %s1035_s25 }
  0xad   : > { %p1041_p1 = scmp.lt.u32.totalorder %s1035_s25, %s269_s21 }
  0xae   : > { %p1040_p11 = por %p1039_p2, %p1038_p0 }
  0xb0   : > { %p1042_p10 = por %p1041_p1, %p1040_p11 }
  0xb2   : > { %p1043_p12 = pnand %p1042_p10, %p1036_p9 }
  0xb4   : > { %1046 = shalt.err (!%p1043_p12)  }
  0xb5   : > { %s1047_s11 = scalar_lea.vmem %s280_s24, 16  ;;  %p1052_p4 = scmp.lt.s32.totalorder %s280_s24, %s1468_s8 }
  0xb6   : > { %p1048_p7 = scmp.ne.s32.totalorder %s280_s24, %s1047_s11  ;;  %p1053_p5 = scmp.lt.s32.totalorder %s1494_s16, %s1047_s11 }
  0xb8   : > { %p1054_p6 = por %p1053_p5, %p1052_p4 }
  0xba   : > { %p1055_p3 = pnand %p1054_p6, %p1048_p7 }
  0xbc   : > { %1058 = shalt.err (!%p1055_p3)  }
  0xbd   : > { %282 = dma.hbm_to_vmem [thread:$0]  %s269_s21, 16, %s280_s24, [#allocation5 + $0x3] }
  0xbe   : > { %s1271_s19 = smov [#allocation2 + $0x4]   ;;  %s1539_s23 = sld [smem:[#allocation7 + $0x5]] }
  0xbf   : > { %s296_s6 = sshll.u32 %s1271_s19, 4  ;;  %s1272_s2 = smov [#allocation2 + $0x5]   ;;  %s297_s6 = int_to_ptr.vmem [resolvable:$true] %s296_s6 }
  0xc0   : > { %s313_s0 = sshll.u32 %s1272_s2, 4  ;;  %s1541_s14 = sld [smem:[#allocation7 + $0x6]]  ;;  %s1544_s0 = int_to_ptr.vmem [resolvable:$true] %s313_s0 }
  0xc1   : > { %s743_s17 = sshll.u32 %s1531_s20, 4 }
  0xc2   : > { %s286_s25 = scalar_lea.hbm %s1678_s1, %s743_s17 }
  0xc3   : > { %s1059_s9 = scalar_lea.hbm %s286_s25, 16  ;;  %p1062_p8 = scmp.lt.u32.totalorder %s286_s25, %s1678_s1 }
  0xc4   : > { %p1060_p13 = scmp.ne.s32.totalorder %s286_s25, %s1059_s9  ;;  %p1063_p9 = scmp.lt.u32.totalorder %s1485_s13, %s1059_s9 }
  0xc5   : > { %p1065_p2 = scmp.lt.u32.totalorder %s1059_s9, %s286_s25 }
  0xc6   : > { %p1064_p0 = por %p1063_p9, %p1062_p8 }
  0xc8   : > { %p1066_p11 = por %p1065_p2, %p1064_p0 }
  0xca   : > { %p1067_p1 = pnand %p1066_p11, %p1060_p13 }
  0xcc   : > { %1070 = shalt.err (!%p1067_p1)  }
  0xcd   : > { %s1071_s7 = scalar_lea.vmem %s297_s6, 16  ;;  %p1076_p12 = scmp.lt.s32.totalorder %s297_s6, %s1468_s8 }
  0xce   : > { %p1072_p10 = scmp.ne.s32.totalorder %s297_s6, %s1071_s7  ;;  %p1077_p7 = scmp.lt.s32.totalorder %s1494_s16, %s1071_s7 }
  0xd0   : > { %p1078_p4 = por %p1077_p7, %p1076_p12 }
  0xd2   : > { %p1079_p5 = pnand %p1078_p4, %p1072_p10 }
  0xd4   : > { %1082 = shalt.err (!%p1079_p5)  }
  0xd5   : > { %299 = dma.hbm_to_vmem [thread:$0]  %s286_s25, 16, %s297_s6, [#allocation5 + $0x4] }
  0xd6   : > { %s745_s20 = sshll.u32 %s1539_s23, 4  ;;  %s1273_s11 = smov [#allocation2 + $0x6]  }
  0xd7   : > { %s330_s19 = sshll.u32 %s1273_s11, 4  ;;  %s303_s15 = scalar_lea.hbm %s1678_s1, %s745_s20  ;;  %s1559_s19 = int_to_ptr.vmem [resolvable:$true] %s330_s19 }
  0xd8   : > { %s1083_s22 = scalar_lea.hbm %s303_s15, 16  ;;  %p1086_p3 = scmp.lt.u32.totalorder %s303_s15, %s1678_s1 }
  0xd9   : > { %p1084_p6 = scmp.ne.s32.totalorder %s303_s15, %s1083_s22  ;;  %p1087_p13 = scmp.lt.u32.totalorder %s1485_s13, %s1083_s22 }
  0xda   : > { %p1089_p9 = scmp.lt.u32.totalorder %s1083_s22, %s303_s15 }
  0xdb   : > { %p1088_p8 = por %p1087_p13, %p1086_p3 }
  0xdd   : > { %p1090_p0 = por %p1089_p9, %p1088_p8 }
  0xdf   : > { %p1091_p2 = pnand %p1090_p0, %p1084_p6 }
  0xe1   : > { %1094 = shalt.err (!%p1091_p2)  }
  0xe2   : > { %s1095_s6 = scalar_lea.vmem %s1544_s0, 16  ;;  %p1100_p1 = scmp.lt.s32.totalorder %s1544_s0, %s1468_s8 }
  0xe3   : > { %p1096_p11 = scmp.ne.s32.totalorder %s1544_s0, %s1095_s6  ;;  %p1101_p10 = scmp.lt.s32.totalorder %s1494_s16, %s1095_s6 }
  0xe5   : > { %p1102_p12 = por %p1101_p10, %p1100_p1 }
  0xe7   : > { %p1103_p7 = pnand %p1102_p12, %p1096_p11 }
  0xe9   : > { %1106 = shalt.err (!%p1103_p7)  }
  0xea   : > { %316 = dma.hbm_to_vmem [thread:$0]  %s303_s15, 16, %s1544_s0, [#allocation5 + $0x5] }
  0xeb   : > { %s747_s23 = sshll.u32 %s1541_s14, 4  ;;  %s748_s25 = sld [smem:[#allocation7 + $0x7]] }
  0xec   : > { %s320_s20 = scalar_lea.hbm %s1678_s1, %s747_s23 }
  0xed   : > { %s1107_s11 = scalar_lea.hbm %s320_s20, 16  ;;  %p1110_p5 = scmp.lt.u32.totalorder %s320_s20, %s1678_s1 }
  0xee   : > { %p1108_p4 = scmp.ne.s32.totalorder %s320_s20, %s1107_s11  ;;  %p1111_p6 = scmp.lt.u32.totalorder %s1485_s13, %s1107_s11 }
  0xef   : > { %p1113_p13 = scmp.lt.u32.totalorder %s1107_s11, %s320_s20 }
  0xf0   : > { %p1112_p3 = por %p1111_p6, %p1110_p5 }
  0xf2   : > { %p1114_p8 = por %p1113_p13, %p1112_p3 }
  0xf4   : > { %p1115_p9 = pnand %p1114_p8, %p1108_p4 }
  0xf6   : > { %1118 = shalt.err (!%p1115_p9)  }
  0xf7   : > { %s1119_s0 = scalar_lea.vmem %s1559_s19, 16  ;;  %p1124_p2 = scmp.lt.s32.totalorder %s1559_s19, %s1468_s8 }
  0xf8   : > { %p1120_p0 = scmp.ne.s32.totalorder %s1559_s19, %s1119_s0  ;;  %p1125_p11 = scmp.lt.s32.totalorder %s1494_s16, %s1119_s0 }
  0xfa   : > { %p1126_p1 = por %p1125_p11, %p1124_p2 }
  0xfc   : > { %p1127_p10 = pnand %p1126_p1, %p1120_p0 }
  0xfe   : > { %1130 = shalt.err (!%p1127_p10)  }
  0xff   : > { %333 = dma.hbm_to_vmem [thread:$0]  %s320_s20, 16, %s1559_s19, [#allocation5 + $0x6] }
 0x100   : > { %s1274_s14 = smov [#allocation2 + $0x7]   ;;  %s749_s22 = sshll.u32 %s748_s25, 4 }
 0x101   : > { %s347_s15 = sshll.u32 %s1274_s14, 4  ;;  %s337_s6 = scalar_lea.hbm %s1678_s1, %s749_s22  ;;  %s348_s15 = int_to_ptr.vmem [resolvable:$true] %s347_s15 }
 0x102   : > { %s1131_s23 = scalar_lea.hbm %s337_s6, 16  ;;  %p1134_p7 = scmp.lt.u32.totalorder %s337_s6, %s1678_s1 }
 0x103   : > { %p1132_p12 = scmp.ne.s32.totalorder %s337_s6, %s1131_s23  ;;  %p1135_p4 = scmp.lt.u32.totalorder %s1485_s13, %s1131_s23 }
 0x104   : > { %p1137_p6 = scmp.lt.u32.totalorder %s1131_s23, %s337_s6 }
 0x105   : > { %p1136_p5 = por %p1135_p4, %p1134_p7 }
 0x107   : > { %p1138_p3 = por %p1137_p6, %p1136_p5 }
 0x109   : > { %p1139_p13 = pnand %p1138_p3, %p1132_p12 }
 0x10b   : > { %1142 = shalt.err (!%p1139_p13)  }
 0x10c   : > { %s1143_s19 = scalar_lea.vmem %s348_s15, 16  ;;  %p1148_p9 = scmp.lt.s32.totalorder %s348_s15, %s1468_s8 }
 0x10d   : > { %p1144_p8 = scmp.ne.s32.totalorder %s348_s15, %s1143_s19  ;;  %p1149_p0 = scmp.lt.s32.totalorder %s1494_s16, %s1143_s19 }
 0x10f   : > { %p1150_p2 = por %p1149_p0, %p1148_p9 }
 0x111   : > { %p1151_p11 = pnand %p1150_p2, %p1144_p8 }
 0x113   : > { %1154 = shalt.err (!%p1151_p11)  }
 0x114   : > { %350 = dma.hbm_to_vmem [thread:$0]  %s337_s6, 16, %s348_s15, [#allocation5 + $0x7] }
 0x115   : > { %1215 = dma.done.wait [#allocation5], 16 }
 0x116   : > { %1216 = vsyncadd [#allocation5], 4294967280 }
 0x117   : > { %1217 = dma.done.wait [#allocation5 + $0x1], 16 }
 0x118   : > { %1218 = vsyncadd [#allocation5 + $0x1], 4294967280 }
 0x119   : > { %1219 = dma.done.wait [#allocation5 + $0x2], 16 }
 0x11a   : > { %1220 = vsyncadd [#allocation5 + $0x2], 4294967280 }
 0x11b   : > { %1221 = dma.done.wait [#allocation5 + $0x3], 16 }
 0x11c   : > { %1222 = vsyncadd [#allocation5 + $0x3], 4294967280 }
 0x11d   : > { %1223 = dma.done.wait [#allocation5 + $0x4], 16 }
 0x11e   : > { %1224 = vsyncadd [#allocation5 + $0x4], 4294967280 }
 0x11f   : > { %1225 = dma.done.wait [#allocation5 + $0x5], 16 }
 0x120   : > { %1226 = vsyncadd [#allocation5 + $0x5], 4294967280 }
 0x121   : > { %1227 = dma.done.wait [#allocation5 + $0x6], 16 }
 0x122   : > { %1228 = vsyncadd [#allocation5 + $0x6], 4294967280 }
 0x123   : > { %1229 = dma.done.wait [#allocation5 + $0x7], 16 }
 0x124   : > { %1230 = vsyncadd [#allocation5 + $0x7], 4294967280 }
 0x125 PF: > { %v380_v2 = vld [vmem:[%s1453_s18 + $0x8] sm:$0xff]  ;;  %v382_v3 = vld [vmem:[%s1453_s18 + $0x18] sm:$0xff]  ;;  %v379_v4 = vld [vmem:[%s1453_s18] sm:$0xff]  ;;  %v1275_v9 = vmov 0.0   ;;  %v413_v52 = vlaneseq  ;;  %s750_s8 = sshll.u32 %s1249_s28, 8  ;;  %v1276_v0 = vmov 0  }
 0x126   : > { %v767_v5 = vpack.c.bf16 %v382_v3, %v380_v2  ;;  %v381_v6 = vld [vmem:[%s1453_s18 + $0x10] sm:$0xff]  ;;  %v384_v7 = vld [vmem:[%s1453_s18 + $0x28] sm:$0xff]  ;;  %v386_v8 = vld [vmem:[%s1453_s18 + $0x38] sm:$0xff]  ;;  %487 = vmatprep.mubr.f32.mxu0 %v1275_v9  ;;  %s495_s13 = sshra.s32 %s750_s8, 7  ;;  %883 = vset.pattern.permute.xlu0 %v1276_v0  ;;  %vm526_vm1 = vcmask 7168   ;;  %p752_p1 = scmp.ne.s32.totalorder %s1249_s28, 1 }
 0x127   : > { %v769_v10 = vpack.c.bf16 %v381_v6, %v379_v4  ;;  %v771_v11 = vpack.c.bf16 %v386_v8, %v384_v7  ;;  %v383_v12 = vld [vmem:[%s1453_s18 + $0x20] sm:$0xff]  ;;  %v385_v13 = vld [vmem:[%s1453_s18 + $0x30] sm:$0xff]  ;;  %v388_v14 = vld [vmem:[%s1453_s18 + $0x48] sm:$0xff]  ;;  %v414_v53 = vshrl.u32 %v413_v52, 7  ;;  %s751_s16 = sshll.u32 %s495_s13, 3 }
 0x128   : > { %768 = vmatprep.subr.bf16.mxu0 %v767_v5  ;;  %v390_v15 = vld [vmem:[%s1453_s18 + $0x58] sm:$0xff]  ;;  %v773_v16 = vpack.c.bf16 %v385_v13, %v383_v12  ;;  %v387_v18 = vld [vmem:[%s1453_s18 + $0x40] sm:$0xff]  ;;  %v389_v19 = vld [vmem:[%s1453_s18 + $0x50] sm:$0xff] }
 0x129   : > { %770 = vmatpush1.bf16.msra.mxu0 %v769_v10  ;;  %v775_v17 = vpack.c.bf16 %v390_v15, %v388_v14  ;;  %v392_v20 = vld [vmem:[%s1453_s18 + $0x68] sm:$0xff]  ;;  %v394_v21 = vld [vmem:[%s1453_s18 + $0x78] sm:$0xff]  ;;  %v777_v22 = vpack.c.bf16 %v389_v19, %v387_v18  ;;  %v391_v24 = vld [vmem:[%s1453_s18 + $0x60] sm:$0xff]  ;;  %v415_v54 = vsub.s32 0, %v414_v53  ;;  %v419_v56 = vsub.s32 1, %v414_v53 }
 0x12a   : > { %772 = vmatprep.subr.bf16.mxu0 %v771_v11  ;;  %v779_v23 = vpack.c.bf16 %v394_v21, %v392_v20  ;;  %v393_v25 = vld [vmem:[%s1453_s18 + $0x70] sm:$0xff]  ;;  %v396_v26 = vld [vmem:[%s1453_s18 + $0x88] sm:$0xff]  ;;  %v398_v27 = vld [vmem:[%s1453_s18 + $0x98] sm:$0xff]  ;;  %v1277_v20 = vmov (!%p752_p1), 0  }
 0x12b   : > { %v781_v28 = vpack.c.bf16 %v393_v25, %v391_v24  ;;  %v783_v29 = vpack.c.bf16 %v398_v27, %v396_v26  ;;  %v395_v30 = vld [vmem:[%s1453_s18 + $0x80] sm:$0xff]  ;;  %v397_v31 = vld [vmem:[%s1453_s18 + $0x90] sm:$0xff]  ;;  %v400_v32 = vld [vmem:[%s1453_s18 + $0xa8] sm:$0xff] }
 0x12c   : > { %v402_v33 = vld [vmem:[%s1453_s18 + $0xb8] sm:$0xff]  ;;  %v785_v34 = vpack.c.bf16 %v397_v31, %v395_v30  ;;  %v399_v36 = vld [vmem:[%s1453_s18 + $0xa0] sm:$0xff]  ;;  %v401_v37 = vld [vmem:[%s1453_s18 + $0xb0] sm:$0xff] }
 0x12d   : > { %774 = vmatpush1.bf16.msra.mxu0 %v773_v16  ;;  %v787_v35 = vpack.c.bf16 %v402_v33, %v400_v32  ;;  %v404_v38 = vld [vmem:[%s1453_s18 + $0xc8] sm:$0xff]  ;;  %v406_v39 = vld [vmem:[%s1453_s18 + $0xd8] sm:$0xff]  ;;  %v789_v40 = vpack.c.bf16 %v401_v37, %v399_v36  ;;  %v403_v42 = vld [vmem:[%s1453_s18 + $0xc0] sm:$0xff] }
 0x12e   : > { %776 = vmatprep.subr.bf16.mxu0 %v775_v17  ;;  %v791_v41 = vpack.c.bf16 %v406_v39, %v404_v38  ;;  %v405_v43 = vld [vmem:[%s1453_s18 + $0xd0] sm:$0xff]  ;;  %v408_v44 = vld [vmem:[%s1453_s18 + $0xe8] sm:$0xff]  ;;  %v410_v45 = vld [vmem:[%s1453_s18 + $0xf8] sm:$0xff] }
 0x12f   : > { %v793_v46 = vpack.c.bf16 %v405_v43, %v403_v42  ;;  %v795_v47 = vpack.c.bf16 %v410_v45, %v408_v44  ;;  %v407_v48 = vld [vmem:[%s1453_s18 + $0xe0] sm:$0xff]  ;;  %v409_v49 = vld [vmem:[%s1453_s18 + $0xf0] sm:$0xff]  ;;  %v378_v51 = vld [vmem:[#allocation2] sm:$0xff]  ;;  %s498_s18 = scalar_lea.vmem [#allocation13], %s751_s16 }
 0x130   : > { %v797_v50 = vpack.c.bf16 %v409_v49, %v407_v48  ;;  %v411_v55 = vld [vmem:[%s1459_s12] sm:$0x3]  ;;  %v504_v1 = vld [vmem:[#allocation3] sm:$0xff]  ;;  %v509_v15 = vld [vmem:[#allocation4] sm:$0xff] }
 0x131   : > { %778 = vmatpush1.bf16.msra.mxu0 %v777_v22  ;;  %v416_v57 = vrot.slane %v411_v55, %v415_v54  ;;  %v420_v58 = vrot.slane %v411_v55, %v419_v56 }
 0x132   : > { %780 = vmatprep.subr.bf16.mxu0 %v779_v23 }
 0x135   : > { %782 = vmatpush1.bf16.msra.mxu0 %v781_v28 }
 0x136   : > { %784 = vmatprep.subr.bf16.mxu0 %v783_v29 }
 0x139   : > { %786 = vmatpush1.bf16.msra.mxu0 %v785_v34 }
 0x13a   : > { %788 = vmatprep.subr.bf16.mxu0 %v787_v35 }
 0x13d   : > { %790 = vmatpush1.bf16.msra.mxu0 %v789_v40 }
 0x13e   : > { %792 = vmatprep.subr.bf16.mxu0 %v791_v41 }
 0x141   : > { %794 = vmatpush1.bf16.msra.mxu0 %v793_v46 }
 0x142   : > { %796 = vmatprep.subr.bf16.mxu0 %v795_v47 }
 0x145   : > { %798 = vmatpush1.bf16.msra.mxu0 %v797_v50 }
 0x148   : > { %488 = vmatmul.mubr.f32.vlgmr.msra.gmra.mrb[0].mxu0 %v378_v51 }
 0x21b   : > { %v489_v59 = vpop.f32.mrb[0].mxu0 }
 0x21c   : > { %v490_v60 = vadd.f32 %v489_v59, %v416_v57  ;;  %v491_v61 = vpop.f32.mrb[1].mxu0 }
 0x21d   : > { %v492_v62 = vadd.f32 %v491_v61, %v420_v58 }
 0x21e   : > { %499 = vst [vmem:[%s498_s18] sm:$0xff] %v490_v60 }
 0x21f   : > { %500 = vst [vmem:[%s498_s18 + $0x8] sm:$0xff] %v492_v62  ;;  %v501_v63 = vmax.f32 %v490_v60, %v492_v62 }
 0x221   : > { %502 = vmax.xlane.f32.xlu0 %v501_v63 }
 0x226   : > { %v538_v25 = vld [vmem:[#allocation13] sm:$0xff] (!%p752_p1)  ;;  %v539_v26 = vld [vmem:[#allocation13 + $0x8] sm:$0xff] (!%p752_p1)  ;;  %v540_v27 = vld [vmem:[#allocation13 + $0x10] sm:$0xff] (!%p752_p1) }
 0x227   : > { %v541_v28 = vld [vmem:[#allocation13 + $0x18] sm:$0xff] (!%p752_p1) }
 0x2ae   : > { %v503_v2 = vpop.xlane.xlu0 %502 }
 0x2af   : > { %v505_v3 = vmax.f32 %v504_v1, %v503_v2 }
 0x2b1   : > { %v506_v4 = vsub.f32 %v504_v1, %v505_v3  ;;  %528 = vst.msk [vmem:[#allocation3] sm:$0xff] %vm526_vm1, %v505_v3  ;;  %513 = vperm.xlu0 %883, %v505_v3  }
 0x2b3   : > { %v507_v13 = vmul.f32 1.442695, %v506_v4 }
 0x2b5   : > { %890 = vset.pattern.permute.xlu0 (!%p752_p1), %v1277_v20 }
 0x2b8   : > { %v533_v22 = vld [vmem:[#allocation3] sm:$0xff] (!%p752_p1) }
 0x330   : > { %v514_v5 = vpop.permute.xlu0 %513 }
 0x331   : > { %v516_v6 = vsub.f32 %v490_v60, %v514_v5  ;;  %v517_v7 = vsub.f32 %v492_v62, %v514_v5 }
 0x333   : > { %v518_v8 = vmul.f32 1.442695, %v516_v6  ;;  %v520_v9 = vmul.f32 1.442695, %v517_v7 }
 0x335   : > { %884 = vpow2.f32 %v518_v8 }
 0x336   : > { %886 = vpow2.f32 %v520_v9 }
 0x337   : > { %888 = vpow2.f32 %v507_v13 }
 0x33f   : > { %v885_v10 = vpop.eup %884 }
 0x340   : > { %v887_v11 = vpop.eup %886 }
 0x341   : > { %v522_v12 = vadd.f32 %v887_v11, %v885_v10  ;;  %v889_v14 = vpop.eup %888 }
 0x342   : > { %v510_v16 = vmul.f32 %v889_v14, %v509_v15 }
 0x343   : > { %523 = vadd.xlane.f32.xlu1 %v522_v12 }
 0x3cd   : > { %532 = sbr.rel (%p752_p1) target bundleno = 1134 (0x46e), region = 76 }
 0x3d0   : > { %v524_v17 = vpop.xlane.xlu1 %523 }
 0x3d1   : > { %v525_v18 = vadd.f32 %v524_v17, %v510_v16 }
 0x3d3   : > { %527 = vst.msk [vmem:[#allocation4] sm:$0xff] %vm526_vm1, %v525_v18 }
 0x3da   : > { %v534_v19 = vld [vmem:[#allocation4] sm:$0xff] }
 0x3db   : > { %891 = vlog2.f32 %v534_v19 }
 0x3e5   : > { %v892_v21 = vpop.eup %891 }
 0x3e6   : > { %v536_v23 = vmul.f32 0.6931472, %v892_v21 }
 0x3e8   : > { %v537_v24 = vadd.f32 %v536_v23, %v533_v22 }
 0x3ea   : > { %544 = vperm.xlu0 %890, %v537_v24  }
 0x469   : > { %v545_v29 = vpop.permute.xlu0 %544 }
 0x46a   : > { %v547_v30 = vsub.f32 %v538_v25, %v545_v29  ;;  %v548_v31 = vsub.f32 %v539_v26, %v545_v29  ;;  %v549_v32 = vsub.f32 %v540_v27, %v545_v29  ;;  %v550_v33 = vsub.f32 %v541_v28, %v545_v29 }
 0x46c   : > { %551 = vst [vmem:[#allocation13] sm:$0xff] %v547_v30  ;;  %552 = vst [vmem:[#allocation13 + $0x8] sm:$0xff] %v548_v31 }
 0x46d   : > { %553 = vst [vmem:[#allocation13 + $0x10] sm:$0xff] %v549_v32  ;;  %554 = vst [vmem:[#allocation13 + $0x18] sm:$0xff] %v550_v33 }
 0x46e PF: > { %s1693_s28 = sadd.s32 4294967295, %s1257_s30   ;;  %s1278_s25 = smov [#allocation13]  }
 0x46f   : > { %p1633_p10 = scmp.eq.s32.totalorder %s1693_s28, 1  ;;  %s565_s20 = sshll.u32 %s1278_s25, 4  ;;  %s566_s20 = int_to_ptr.vmem [resolvable:$true] %s565_s20 }
 0x470   : > { %s1155_s11 = scalar_lea.vmem %s566_s20, 512  ;;  %p1162_p5 = scmp.lt.s32.totalorder %s566_s20, %s566_s20 }
 0x471   : > { %p1156_p12 = scmp.ne.s32.totalorder %s566_s20, %s1155_s11  ;;  %p1163_p6 = scmp.lt.s32.totalorder %s1155_s11, %s1155_s11 }
 0x473   : > { %p1157_p7 = pnand %p1156_p12, %p1633_p10  ;;  %p1164_p3 = por %p1163_p6, %p1162_p5 }
 0x475   : > { %p1158_p4 = pneg %p1157_p7 }
 0x477   : > { %p1165_p13 = pnand %p1164_p3, %p1158_p4 }
 0x479   : > { %1168 = shalt.err (!%p1165_p13)
}
 0x47a   : > { %s1169_s0 = scalar_lea.hbm %s1681_s4, 512 }
 0x47b   : > { %p1170_p8 = scmp.ne.s32.totalorder %s1681_s4, %s1169_s0  ;;  %p1175_p2 = scmp.lt.u32.totalorder %s1169_s0, %s1681_s4 }
 0x47d   : > { %p1171_p9 = pnand %p1170_p8, %p1633_p10 }
 0x47f   : > { %p1172_p0 = pneg %p1171_p9 }
 0x481   : > { %p1177_p11 = pnand %p1175_p2, %p1172_p0 }
 0x483   : > { %1180 = shalt.err (!%p1177_p11)
}
 0x484   : > { %804 = dma.vmem_to_hbm [thread:$0]  (%p1633_p10), %s566_s20, 512, %s1681_s4, [#allocation10]  }
 0x485   : > { %1232 = dma.done.wait (%p1633_p10), [#allocation10], 512  }
 0x486   : > { %1234 = vsyncadd (%p1633_p10), [#allocation10], 4294966784 }
 0x487 PF: > { %s25_s30 = sadd.s32 1, %s1257_s30   ;;  %s1695_s25 = smov %s1241_s26 }
 0x488   : > { %p22_p1 = scmp.ge.s32.totalorder %s25_s30, 4   ;;  %s1696_s26 = smov %s1245_s27 }
 0x489   : > { %s1697_s27 = smov %s1367_s10  ;;  %s1698_s28 = smov %s1253_s29 }
 0x48a   : > { %s1699_s29 = smov %s1701_s5  ;;  %24 = sbr.rel (!%p22_p1) target bundleno = 19 (0x13), region = 149 }
 0x491   :  { %578 = vsyncpa [#allocation9], 1 }
 0x492   :  { %580 = vsyncpa [#allocation9 + $0x1], 1 }
 0x493   :  { %581 = vsyncpa [#allocation12], 1 }
 0x494   :  { %583 = vsyncpa [#allocation12 + $0x1], 1 }
 0x495   :  { %584 = vsyncpa [#allocation10], 1 }
 0x496   :  { %586 = vsyncpa [#allocation10 + $0x1], 1 }
 0x497   :  { %587 = vsyncmov [#allocation5] }
 0x49a   :  { %s588_s23 = vpop.sfrf %587 }
 0x49b   :  { %p757_p10 = scmp.ne.s32.totalorder %s588_s23, 0 }
 0x49d   :  { %592 = shalt.err (%p757_p10)  }
 0x49e   :  { %594 = vsyncmov [#allocation5 + $0x1] }
 0x4a1   :  { %s595_s24 = vpop.sfrf %594 }
 0x4a2   :  { %p758_p12 = scmp.ne.s32.totalorder %s595_s24, 0 }
 0x4a4   :  { %599 = shalt.err (%p758_p12)  }
 0x4a5   :  { %601 = vsyncmov [#allocation5 + $0x2] }
 0x4a8   :  { %s602_s10 = vpop.sfrf %601 }
 0x4a9   :  { %p759_p7 = scmp.ne.s32.totalorder %s602_s10, 0 }
 0x4ab   :  { %606 = shalt.err (%p759_p7)  }
 0x4ac   :  { %608 = vsyncmov [#allocation5 + $0x3] }
 0x4af   :  { %s609_s30 = vpop.sfrf %608 }
 0x4b0   :  { %p760_p4 = scmp.ne.s32.totalorder %s609_s30, 0 }
 0x4b2   :  { %613 = shalt.err (%p760_p4)  }
 0x4b3   :  { %615 = vsyncmov [#allocation5 + $0x4] }
 0x4b6   :  { %s616_s1 = vpop.sfrf %615 }
 0x4b7   :  { %p761_p5 = scmp.ne.s32.totalorder %s616_s1, 0 }
 0x4b9   :  { %620 = shalt.err (%p761_p5)  }
 0x4ba   :  { %622 = vsyncmov [#allocation5 + $0x5] }
 0x4bd   :  { %s623_s3 = vpop.sfrf %622 }
 0x4be   :  { %p762_p6 = scmp.ne.s32.totalorder %s623_s3, 0 }
 0x4c0   :  { %627 = shalt.err (%p762_p6)  }
 0x4c1   :  { %629 = vsyncmov [#allocation5 + $0x6] }
 0x4c4   :  { %s630_s4 = vpop.sfrf %629 }
 0x4c5   :  { %p763_p3 = scmp.ne.s32.totalorder %s630_s4, 0 }
 0x4c7   :  { %634 = shalt.err (%p763_p3)  }
 0x4c8   :  { %636 = vsyncmov [#allocation5 + $0x7] }
 0x4cb   :  { %s637_s26 = vpop.sfrf %636 }
 0x4cc   :  { %p764_p13 = scmp.ne.s32.totalorder %s637_s26, 0 }
 0x4ce   :  { %641 = shalt.err (%p764_p13)  }

</bundles_post_ra>
